<compile_context>
chip_gen: v7x
topology: tpu7x:2x2x1
jax: 0.10.0
libtpu: 0.0.40
codegen_flags: <defaults>
</compile_context>

<pallas_src>
import functools

import jax
import jax.numpy as jnp
from jax import lax
from jax.experimental import pallas as pl
from jax.experimental.pallas import tpu as pltpu

_SUBLANES = 8
_LANES = 128
_INT32_MIN = -2147483648
_INT32_MAX = 2147483647


def _hnm_kernel(x_ref, out_ref, *, k):
    """Exact per-row top-k sum for an (8, P_pad) tile of flattened loss rows."""
    bt = x_ref.shape[0]
    x = x_ref[...].astype(jnp.float32)                      # (bt, P_pad)

    # Monotonic int32 key of the f32 bit pattern: non-negative floats keep
    # their raw bits; negative floats get the low 31 bits flipped.
    bits = pltpu.bitcast(x, jnp.int32)
    skey = jnp.where(bits < 0, bits ^ jnp.int32(_INT32_MAX), bits)

    k_i32 = jnp.int32(k)

    def count_ge(thresh):                                   # thresh: (bt, 1)
        return jnp.sum((skey >= thresh).astype(jnp.int32), axis=-1,
                       keepdims=True)

    # Per row, build the largest key t with count(skey >= t) >= k (i.e. the
    # k-th largest key), MSB-first.  The sign bit is handled by testing
    # candidate 0; the remaining 31 bits are unrolled with static constants.
    zero = jnp.zeros((bt, 1), jnp.int32)
    int_min = jnp.full((bt, 1), _INT32_MIN, jnp.int32)
    prefix = jnp.where(count_ge(zero) >= k_i32, zero, int_min)
    for bit in range(30, -1, -1):
        cand = prefix | jnp.int32(1 << bit)
        prefix = jnp.where(count_ge(cand) >= k_i32, cand, prefix)

    # Final pass: sum of strictly-greater values plus (k - #greater) copies of
    # the k-th value (exact tie correction; -inf lane padding never selected).
    gt = skey > prefix
    cnt_gt = jnp.sum(gt.astype(jnp.int32), axis=-1, keepdims=True)
    sum_gt = jnp.sum(jnp.where(gt, x, 0.0), axis=-1, keepdims=True)
    kth_val = jnp.max(jnp.where(skey == prefix, x, -jnp.inf), axis=-1,
                      keepdims=True)
    row_sum = sum_gt + (jnp.float32(k) - cnt_gt.astype(jnp.float32)) * kth_val

    # Lane-dense (unmasked) store of the per-row partial top-k sums.
    out_ref[...] = jnp.broadcast_to(row_sum, out_ref.shape)


def hard_negative_mining(loss, perc=0.25):
    """Pallas implementation of HardNegativeMining.forward(loss, _)."""
    b = loss.shape[0]
    flat = loss.reshape(b, -1)                 # keep original dtype in HBM
    p = flat.shape[1]
    k = int(perc * p)
    assert k >= 1, "perc * p must be >= 1"

    p_pad = ((p + _LANES - 1) // _LANES) * _LANES
    b_pad = ((b + _SUBLANES - 1) // _SUBLANES) * _SUBLANES

    # -inf lane padding is never selected (k <= p real elements per row);
    # padded batch rows produce junk partial sums that are sliced away below.
    padded = jnp.full((b_pad, p_pad), -jnp.inf, dtype=flat.dtype)
    padded = padded.at[:b, :p].set(flat)

    # TODO(synk): for segmentation-sized rows (P in the multi-million range)
    # add a second "arbitrary" grid axis over P-chunks so the (8, P_pad) tile
    # fits v7x's 64 MiB VMEM; not needed at these shapes.
    kernel = functools.partial(_hnm_kernel, k=k)
    row_sums = pl.pallas_call(
        kernel,
        out_shape=jax.ShapeDtypeStruct((b_pad, _LANES), jnp.float32),
        grid_spec=pltpu.PrefetchScalarGridSpec(
            num_scalar_prefetch=0,
            grid=(b_pad // _SUBLANES,),
            in_specs=[pl.BlockSpec((_SUBLANES, p_pad), lambda i: (i, 0))],
            out_specs=pl.BlockSpec((_SUBLANES, _LANES), lambda i: (i, 0)),
        ),
        compiler_params=pltpu.CompilerParams(
            dimension_semantics=("parallel",)),
    )(padded)

    return jnp.sum(row_sums[:b, 0]) / jnp.float32(b * k)


if __name__ == "__main__":
    key = jax.random.PRNGKey(0)
    # small NCHW per-element loss tensor, consistent with the module's reshape
    x = jax.random.normal(key, (2, 4, 16, 16), dtype=jnp.float32)

    result = hard_negative_mining(x, perc=0.25)
    result = jax.block_until_ready(result)

    # pure-JAX reference (same semantics as torch.topk(...).values.mean())
    b = x.shape[0]
    flat = x.reshape(b, -1)
    k = int(0.25 * flat.shape[1])
    ref = jnp.mean(lax.top_k(flat, k)[0])

    assert jnp.allclose(result, ref, rtol=1e-5, atol=1e-5), (result, ref)
    print("KERNEL_OK")
</pallas_src>

<mosaic_0001>
module attributes {stable_mosaic.version = 11 : i64} {
  func.func @_hnm_kernel(%arg0: i32, %arg1: memref<8x1024xf32, #tpu.memory_space<vmem>>, %arg2: memref<8x128xf32, #tpu.memory_space<vmem>>) attributes {dimension_semantics = [#tpu.dimension_semantics<parallel>], iteration_bounds = array<i64: 1>, scalar_prefetch = 0 : i64, scratch_operands = 0 : i64, tpu.core_type = #tpu.core_type<tc>, window_params = [{transform_indices = @transform_0, window_bounds = array<i64: 8, 1024>}, {transform_indices = @transform_1, window_bounds = array<i64: 8, 128>}]} {
    %c0 = arith.constant 0 : index
    %c0_0 = arith.constant 0 : index
    %0 = vector.load %arg1[%c0, %c0_0] : memref<8x1024xf32, #tpu.memory_space<vmem>>, vector<8x1024xf32>
    %1 = tpu.bitcast %0 : vector<8x1024xf32> -> vector<8x1024xi32>
    %c0_i32 = arith.constant 0 : i32
    %2 = vector.broadcast %c0_i32 : i32 to vector<8x1024xi32>
    %3 = arith.cmpi slt, %1, %2 : vector<8x1024xi32>
    %c2147483647_i32 = arith.constant 2147483647 : i32
    %4 = vector.broadcast %c2147483647_i32 : i32 to vector<8x1024xi32>
    %5 = arith.xori %1, %4 : vector<8x1024xi32>
    %6 = arith.select %3, %5, %1 : vector<8x1024xi1>, vector<8x1024xi32>
    %c0_i32_1 = arith.constant 0 : i32
    %7 = vector.broadcast %c0_i32_1 : i32 to vector<8x1xi32>
    %c-2147483648_i32 = arith.constant -2147483648 : i32
    %8 = vector.broadcast %c-2147483648_i32 : i32 to vector<8x1xi32>
    %9 = vector.broadcast %7 : vector<8x1xi32> to vector<8x1024xi32>
    %10 = arith.cmpi sge, %6, %9 : vector<8x1024xi32>
    %11 = arith.extui %10 : vector<8x1024xi1> to vector<8x1024xi32>
    %cst = arith.constant dense<0> : vector<8xi32>
    %12 = vector.multi_reduction <add>, %11, %cst [1] : vector<8x1024xi32> to vector<8xi32>
    %13 = vector.shape_cast %12 : vector<8xi32> to vector<8x1xi32>
    %c256_i32 = arith.constant 256 : i32
    %14 = vector.broadcast %c256_i32 : i32 to vector<8x1xi32>
    %15 = arith.cmpi sge, %13, %14 : vector<8x1xi32>
    %16 = arith.select %15, %7, %8 : vector<8x1xi1>, vector<8x1xi32>
    %c1073741824_i32 = arith.constant 1073741824 : i32
    %17 = vector.broadcast %c1073741824_i32 : i32 to vector<8x1xi32>
    %18 = arith.ori %16, %17 : vector<8x1xi32>
    %19 = vector.broadcast %18 : vector<8x1xi32> to vector<8x1024xi32>
    %20 = arith.cmpi sge, %6, %19 : vector<8x1024xi32>
    %21 = arith.extui %20 : vector<8x1024xi1> to vector<8x1024xi32>
    %cst_2 = arith.constant dense<0> : vector<8xi32>
    %22 = vector.multi_reduction <add>, %21, %cst_2 [1] : vector<8x1024xi32> to vector<8xi32>
    %23 = vector.shape_cast %22 : vector<8xi32> to vector<8x1xi32>
    %c256_i32_3 = arith.constant 256 : i32
    %24 = vector.broadcast %c256_i32_3 : i32 to vector<8x1xi32>
    %25 = arith.cmpi sge, %23, %24 : vector<8x1xi32>
    %26 = arith.select %25, %18, %16 : vector<8x1xi1>, vector<8x1xi32>
    %c536870912_i32 = arith.constant 536870912 : i32
    %27 = vector.broadcast %c536870912_i32 : i32 to vector<8x1xi32>
    %28 = arith.ori %26, %27 : vector<8x1xi32>
    %29 = vector.broadcast %28 : vector<8x1xi32> to vector<8x1024xi32>
    %30 = arith.cmpi sge, %6, %29 : vector<8x1024xi32>
    %31 = arith.extui %30 : vector<8x1024xi1> to vector<8x1024xi32>
    %cst_4 = arith.constant dense<0> : vector<8xi32>
    %32 = vector.multi_reduction <add>, %31, %cst_4 [1] : vector<8x1024xi32> to vector<8xi32>
    %33 = vector.shape_cast %32 : vector<8xi32> to vector<8x1xi32>
    %c256_i32_5 = arith.constant 256 : i32
    %34 = vector.broadcast %c256_i32_5 : i32 to vector<8x1xi32>
    %35 = arith.cmpi sge, %33, %34 : vector<8x1xi32>
    %36 = arith.select %35, %28, %26 : vector<8x1xi1>, vector<8x1xi32>
    %c268435456_i32 = arith.constant 268435456 : i32
    %37 = vector.broadcast %c268435456_i32 : i32 to vector<8x1xi32>
    %38 = arith.ori %36, %37 : vector<8x1xi32>
    %39 = vector.broadcast %38 : vector<8x1xi32> to vector<8x1024xi32>
    %40 = arith.cmpi sge, %6, %39 : vector<8x1024xi32>
    %41 = arith.extui %40 : vector<8x1024xi1> to vector<8x1024xi32>
    %cst_6 = arith.constant dense<0> : vector<8xi32>
    %42 = vector.multi_reduction <add>, %41, %cst_6 [1] : vector<8x1024xi32> to vector<8xi32>
    %43 = vector.shape_cast %42 : vector<8xi32> to vector<8x1xi32>
    %c256_i32_7 = arith.constant 256 : i32
    %44 = vector.broadcast %c256_i32_7 : i32 to vector<8x1xi32>
    %45 = arith.cmpi sge, %43, %44 : vector<8x1xi32>
    %46 = arith.select %45, %38, %36 : vector<8x1xi1>, vector<8x1xi32>
    %c134217728_i32 = arith.constant 134217728 : i32
    %47 = vector.broadcast %c134217728_i32 : i32 to vector<8x1xi32>
    %48 = arith.ori %46, %47 : vector<8x1xi32>
    %49 = vector.broadcast %48 : vector<8x1xi32> to vector<8x1024xi32>
    %50 = arith.cmpi sge, %6, %49 : vector<8x1024xi32>
    %51 = arith.extui %50 : vector<8x1024xi1> to vector<8x1024xi32>
    %cst_8 = arith.constant dense<0> : vector<8xi32>
    %52 = vector.multi_reduction <add>, %51, %cst_8 [1] : vector<8x1024xi32> to vector<8xi32>
    %53 = vector.shape_cast %52 : vector<8xi32> to vector<8x1xi32>
    %c256_i32_9 = arith.constant 256 : i32
    %54 = vector.broadcast %c256_i32_9 : i32 to vector<8x1xi32>
    %55 = arith.cmpi sge, %53, %54 : vector<8x1xi32>
    %56 = arith.select %55, %48, %46 : vector<8x1xi1>, vector<8x1xi32>
    %c67108864_i32 = arith.constant 67108864 : i32
    %57 = vector.broadcast %c67108864_i32 : i32 to vector<8x1xi32>
    %58 = arith.ori %56, %57 : vector<8x1xi32>
    %59 = vector.broadcast %58 : vector<8x1xi32> to vector<8x1024xi32>
    %60 = arith.cmpi sge, %6, %59 : vector<8x1024xi32>
    %61 = arith.extui %60 : vector<8x1024xi1> to vector<8x1024xi32>
    %cst_10 = arith.constant dense<0> : vector<8xi32>
    %62 = vector.multi_reduction <add>, %61, %cst_10 [1] : vector<8x1024xi32> to vector<8xi32>
    %63 = vector.shape_cast %62 : vector<8xi32> to vector<8x1xi32>
    %c256_i32_11 = arith.constant 256 : i32
    %64 = vector.broadcast %c256_i32_11 : i32 to vector<8x1xi32>
    %65 = arith.cmpi sge, %63, %64 : vector<8x1xi32>
    %66 = arith.select %65, %58, %56 : vector<8x1xi1>, vector<8x1xi32>
    %c33554432_i32 = arith.constant 33554432 : i32
    %67 = vector.broadcast %c33554432_i32 : i32 to vector<8x1xi32>
    %68 = arith.ori %66, %67 : vector<8x1xi32>
    %69 = vector.broadcast %68 : vector<8x1xi32> to vector<8x1024xi32>
    %70 = arith.cmpi sge, %6, %69 : vector<8x1024xi32>
    %71 = arith.extui %70 : vector<8x1024xi1> to vector<8x1024xi32>
    %cst_12 = arith.constant dense<0> : vector<8xi32>
    %72 = vector.multi_reduction <add>, %71, %cst_12 [1] : vector<8x1024xi32> to vector<8xi32>
    %73 = vector.shape_cast %72 : vector<8xi32> to vector<8x1xi32>
    %c256_i32_13 = arith.constant 256 : i32
    %74 = vector.broadcast %c256_i32_13 : i32 to vector<8x1xi32>
    %75 = arith.cmpi sge, %73, %74 : vector<8x1xi32>
    %76 = arith.select %75, %68, %66 : vector<8x1xi1>, vector<8x1xi32>
    %c16777216_i32 = arith.constant 16777216 : i32
    %77 = vector.broadcast %c16777216_i32 : i32 to vector<8x1xi32>
    %78 = arith.ori %76, %77 : vector<8x1xi32>
    %79 = vector.broadcast %78 : vector<8x1xi32> to vector<8x1024xi32>
    %80 = arith.cmpi sge, %6, %79 : vector<8x1024xi32>
    %81 = arith.extui %80 : vector<8x1024xi1> to vector<8x1024xi32>
    %cst_14 = arith.constant dense<0> : vector<8xi32>
    %82 = vector.multi_reduction <add>, %81, %cst_14 [1] : vector<8x1024xi32> to vector<8xi32>
    %83 = vector.shape_cast %82 : vector<8xi32> to vector<8x1xi32>
    %c256_i32_15 = arith.constant 256 : i32
    %84 = vector.broadcast %c256_i32_15 : i32 to vector<8x1xi32>
    %85 = arith.cmpi sge, %83, %84 : vector<8x1xi32>
    %86 = arith.select %85, %78, %76 : vector<8x1xi1>, vector<8x1xi32>
    %c8388608_i32 = arith.constant 8388608 : i32
    %87 = vector.broadcast %c8388608_i32 : i32 to vector<8x1xi32>
    %88 = arith.ori %86, %87 : vector<8x1xi32>
    %89 = vector.broadcast %88 : vector<8x1xi32> to vector<8x1024xi32>
    %90 = arith.cmpi sge, %6, %89 : vector<8x1024xi32>
    %91 = arith.extui %90 : vector<8x1024xi1> to vector<8x1024xi32>
    %cst_16 = arith.constant dense<0> : vector<8xi32>
    %92 = vector.multi_reduction <add>, %91, %cst_16 [1] : vector<8x1024xi32> to vector<8xi32>
    %93 = vector.shape_cast %92 : vector<8xi32> to vector<8x1xi32>
    %c256_i32_17 = arith.constant 256 : i32
    %94 = vector.broadcast %c256_i32_17 : i32 to vector<8x1xi32>
    %95 = arith.cmpi sge, %93, %94 : vector<8x1xi32>
    %96 = arith.select %95, %88, %86 : vector<8x1xi1>, vector<8x1xi32>
    %c4194304_i32 = arith.constant 4194304 : i32
    %97 = vector.broadcast %c4194304_i32 : i32 to vector<8x1xi32>
    %98 = arith.ori %96, %97 : vector<8x1xi32>
    %99 = vector.broadcast %98 : vector<8x1xi32> to vector<8x1024xi32>
    %100 = arith.cmpi sge, %6, %99 : vector<8x1024xi32>
    %101 = arith.extui %100 : vector<8x1024xi1> to vector<8x1024xi32>
    %cst_18 = arith.constant dense<0> : vector<8xi32>
    %102 = vector.multi_reduction <add>, %101, %cst_18 [1] : vector<8x1024xi32> to vector<8xi32>
    %103 = vector.shape_cast %102 : vector<8xi32> to vector<8x1xi32>
    %c256_i32_19 = arith.constant 256 : i32
    %104 = vector.broadcast %c256_i32_19 : i32 to vector<8x1xi32>
    %105 = arith.cmpi sge, %103, %104 : vector<8x1xi32>
    %106 = arith.select %105, %98, %96 : vector<8x1xi1>, vector<8x1xi32>
    %c2097152_i32 = arith.constant 2097152 : i32
    %107 = vector.broadcast %c2097152_i32 : i32 to vector<8x1xi32>
    %108 = arith.ori %106, %107 : vector<8x1xi32>
    %109 = vector.broadcast %108 : vector<8x1xi32> to vector<8x1024xi32>
    %110 = arith.cmpi sge, %6, %109 : vector<8x1024xi32>
    %111 = arith.extui %110 : vector<8x1024xi1> to vector<8x1024xi32>
    %cst_20 = arith.constant dense<0> : vector<8xi32>
    %112 = vector.multi_reduction <add>, %111, %cst_20 [1] : vector<8x1024xi32> to vector<8xi32>
    %113 = vector.shape_cast %112 : vector<8xi32> to vector<8x1xi32>
    %c256_i32_21 = arith.constant 256 : i32
    %114 = vector.broadcast %c256_i32_21 : i32 to vector<8x1xi32>
    %115 = arith.cmpi sge, %113, %114 : vector<8x1xi32>
    %116 = arith.select %115, %108, %106 : vector<8x1xi1>, vector<8x1xi32>
    %c1048576_i32 = arith.constant 1048576 : i32
    %117 = vector.broadcast %c1048576_i32 : i32 to vector<8x1xi32>
    %118 = arith.ori %116, %117 : vector<8x1xi32>
    %119 = vector.broadcast %118 : vector<8x1xi32> to vector<8x1024xi32>
    %120 = arith.cmpi sge, %6, %119 : vector<8x1024xi32>
    %121 = arith.extui %120 : vector<8x1024xi1> to vector<8x1024xi32>
    %cst_22 = arith.constant dense<0> : vector<8xi32>
    %122 = vector.multi_reduction <add>, %121, %cst_22 [1] : vector<8x1024xi32> to vector<8xi32>
    %123 = vector.shape_cast %122 : vector<8xi32> to vector<8x1xi32>
    %c256_i32_23 = arith.constant 256 : i32
    %124 = vector.broadcast %c256_i32_23 : i32 to vector<8x1xi32>
    %125 = arith.cmpi sge, %123, %124 : vector<8x1xi32>
    %126 = arith.select %125, %118, %116 : vector<8x1xi1>, vector<8x1xi32>
    %c524288_i32 = arith.constant 524288 : i32
    %127 = vector.broadcast %c524288_i32 : i32 to vector<8x1xi32>
    %128 = arith.ori %126, %127 : vector<8x1xi32>
    %129 = vector.broadcast %128 : vector<8x1xi32> to vector<8x1024xi32>
    %130 = arith.cmpi sge, %6, %129 : vector<8x1024xi32>
    %131 = arith.extui %130 : vector<8x1024xi1> to vector<8x1024xi32>
    %cst_24 = arith.constant dense<0> : vector<8xi32>
    %132 = vector.multi_reduction <add>, %131, %cst_24 [1] : vector<8x1024xi32> to vector<8xi32>
    %133 = vector.shape_cast %132 : vector<8xi32> to vector<8x1xi32>
    %c256_i32_25 = arith.constant 256 : i32
    %134 = vector.broadcast %c256_i32_25 : i32 to vector<8x1xi32>
    %135 = arith.cmpi sge, %133, %134 : vector<8x1xi32>
    %136 = arith.select %135, %128, %126 : vector<8x1xi1>, vector<8x1xi32>
    %c262144_i32 = arith.constant 262144 : i32
    %137 = vector.broadcast %c262144_i32 : i32 to vector<8x1xi32>
    %138 = arith.ori %136, %137 : vector<8x1xi32>
    %139 = vector.broadcast %138 : vector<8x1xi32> to vector<8x1024xi32>
    %140 = arith.cmpi sge, %6, %139 : vector<8x1024xi32>
    %141 = arith.extui %140 : vector<8x1024xi1> to vector<8x1024xi32>
    %cst_26 = arith.constant dense<0> : vector<8xi32>
    %142 = vector.multi_reduction <add>, %141, %cst_26 [1] : vector<8x1024xi32> to vector<8xi32>
    %143 = vector.shape_cast %142 : vector<8xi32> to vector<8x1xi32>
    %c256_i32_27 = arith.constant 256 : i32
    %144 = vector.broadcast %c256_i32_27 : i32 to vector<8x1xi32>
    %145 = arith.cmpi sge, %143, %144 : vector<8x1xi32>
    %146 = arith.select %145, %138, %136 : vector<8x1xi1>, vector<8x1xi32>
    %c131072_i32 = arith.constant 131072 : i32
    %147 = vector.broadcast %c131072_i32 : i32 to vector<8x1xi32>
    %148 = arith.ori %146, %147 : vector<8x1xi32>
    %149 = vector.broadcast %148 : vector<8x1xi32> to vector<8x1024xi32>
    %150 = arith.cmpi sge, %6, %149 : vector<8x1024xi32>
    %151 = arith.extui %150 : vector<8x1024xi1> to vector<8x1024xi32>
    %cst_28 = arith.constant dense<0> : vector<8xi32>
    %152 = vector.multi_reduction <add>, %151, %cst_28 [1] : vector<8x1024xi32> to vector<8xi32>
    %153 = vector.shape_cast %152 : vector<8xi32> to vector<8x1xi32>
    %c256_i32_29 = arith.constant 256 : i32
    %154 = vector.broadcast %c256_i32_29 : i32 to vector<8x1xi32>
    %155 = arith.cmpi sge, %153, %154 : vector<8x1xi32>
    %156 = arith.select %155, %148, %146 : vector<8x1xi1>, vector<8x1xi32>
    %c65536_i32 = arith.constant 65536 : i32
    %157 = vector.broadcast %c65536_i32 : i32 to vector<8x1xi32>
    %158 = arith.ori %156, %157 : vector<8x1xi32>
    %159 = vector.broadcast %158 : vector<8x1xi32> to vector<8x1024xi32>
    %160 = arith.cmpi sge, %6, %159 : vector<8x1024xi32>
    %161 = arith.extui %160 : vector<8x1024xi1> to vector<8x1024xi32>
    %cst_30 = arith.constant dense<0> : vector<8xi32>
    %162 = vector.multi_reduction <add>, %161, %cst_30 [1] : vector<8x1024xi32> to vector<8xi32>
    %163 = vector.shape_cast %162 : vector<8xi32> to vector<8x1xi32>
    %c256_i32_31 = arith.constant 256 : i32
    %164 = vector.broadcast %c256_i32_31 : i32 to vector<8x1xi32>
    %165 = arith.cmpi sge, %163, %164 : vector<8x1xi32>
    %166 = arith.select %165, %158, %156 : vector<8x1xi1>, vector<8x1xi32>
    %c32768_i32 = arith.constant 32768 : i32
    %167 = vector.broadcast %c32768_i32 : i32 to vector<8x1xi32>
    %168 = arith.ori %166, %167 : vector<8x1xi32>
    %169 = vector.broadcast %168 : vector<8x1xi32> to vector<8x1024xi32>
    %170 = arith.cmpi sge, %6, %169 : vector<8x1024xi32>
    %171 = arith.extui %170 : vector<8x1024xi1> to vector<8x1024xi32>
    %cst_32 = arith.constant dense<0> : vector<8xi32>
    %172 = vector.multi_reduction <add>, %171, %cst_32 [1] : vector<8x1024xi32> to vector<8xi32>
    %173 = vector.shape_cast %172 : vector<8xi32> to vector<8x1xi32>
    %c256_i32_33 = arith.constant 256 : i32
    %174 = vector.broadcast %c256_i32_33 : i32 to vector<8x1xi32>
    %175 = arith.cmpi sge, %173, %174 : vector<8x1xi32>
    %176 = arith.select %175, %168, %166 : vector<8x1xi1>, vector<8x1xi32>
    %c16384_i32 = arith.constant 16384 : i32
    %177 = vector.broadcast %c16384_i32 : i32 to vector<8x1xi32>
    %178 = arith.ori %176, %177 : vector<8x1xi32>
    %179 = vector.broadcast %178 : vector<8x1xi32> to vector<8x1024xi32>
    %180 = arith.cmpi sge, %6, %179 : vector<8x1024xi32>
    %181 = arith.extui %180 : vector<8x1024xi1> to vector<8x1024xi32>
    %cst_34 = arith.constant dense<0> : vector<8xi32>
    %182 = vector.multi_reduction <add>, %181, %cst_34 [1] : vector<8x1024xi32> to vector<8xi32>
    %183 = vector.shape_cast %182 : vector<8xi32> to vector<8x1xi32>
    %c256_i32_35 = arith.constant 256 : i32
    %184 = vector.broadcast %c256_i32_35 : i32 to vector<8x1xi32>
    %185 = arith.cmpi sge, %183, %184 : vector<8x1xi32>
    %186 = arith.select %185, %178, %176 : vector<8x1xi1>, vector<8x1xi32>
    %c8192_i32 = arith.constant 8192 : i32
    %187 = vector.broadcast %c8192_i32 : i32 to vector<8x1xi32>
    %188 = arith.ori %186, %187 : vector<8x1xi32>
    %189 = vector.broadcast %188 : vector<8x1xi32> to vector<8x1024xi32>
    %190 = arith.cmpi sge, %6, %189 : vector<8x1024xi32>
    %191 = arith.extui %190 : vector<8x1024xi1> to vector<8x1024xi32>
    %cst_36 = arith.constant dense<0> : vector<8xi32>
    %192 = vector.multi_reduction <add>, %191, %cst_36 [1] : vector<8x1024xi32> to vector<8xi32>
    %193 = vector.shape_cast %192 : vector<8xi32> to vector<8x1xi32>
    %c256_i32_37 = arith.constant 256 : i32
    %194 = vector.broadcast %c256_i32_37 : i32 to vector<8x1xi32>
    %195 = arith.cmpi sge, %193, %194 : vector<8x1xi32>
    %196 = arith.select %195, %188, %186 : vector<8x1xi1>, vector<8x1xi32>
    %c4096_i32 = arith.constant 4096 : i32
    %197 = vector.broadcast %c4096_i32 : i32 to vector<8x1xi32>
    %198 = arith.ori %196, %197 : vector<8x1xi32>
    %199 = vector.broadcast %198 : vector<8x1xi32> to vector<8x1024xi32>
    %200 = arith.cmpi sge, %6, %199 : vector<8x1024xi32>
    %201 = arith.extui %200 : vector<8x1024xi1> to vector<8x1024xi32>
    %cst_38 = arith.constant dense<0> : vector<8xi32>
    %202 = vector.multi_reduction <add>, %201, %cst_38 [1] : vector<8x1024xi32> to vector<8xi32>
    %203 = vector.shape_cast %202 : vector<8xi32> to vector<8x1xi32>
    %c256_i32_39 = arith.constant 256 : i32
    %204 = vector.broadcast %c256_i32_39 : i32 to vector<8x1xi32>
    %205 = arith.cmpi sge, %203, %204 : vector<8x1xi32>
    %206 = arith.select %205, %198, %196 : vector<8x1xi1>, vector<8x1xi32>
    %c2048_i32 = arith.constant 2048 : i32
    %207 = vector.broadcast %c2048_i32 : i32 to vector<8x1xi32>
    %208 = arith.ori %206, %207 : vector<8x1xi32>
    %209 = vector.broadcast %208 : vector<8x1xi32> to vector<8x1024xi32>
    %210 = arith.cmpi sge, %6, %209 : vector<8x1024xi32>
    %211 = arith.extui %210 : vector<8x1024xi1> to vector<8x1024xi32>
    %cst_40 = arith.constant dense<0> : vector<8xi32>
    %212 = vector.multi_reduction <add>, %211, %cst_40 [1] : vector<8x1024xi32> to vector<8xi32>
    %213 = vector.shape_cast %212 : vector<8xi32> to vector<8x1xi32>
    %c256_i32_41 = arith.constant 256 : i32
    %214 = vector.broadcast %c256_i32_41 : i32 to vector<8x1xi32>
    %215 = arith.cmpi sge, %213, %214 : vector<8x1xi32>
    %216 = arith.select %215, %208, %206 : vector<8x1xi1>, vector<8x1xi32>
    %c1024_i32 = arith.constant 1024 : i32
    %217 = vector.broadcast %c1024_i32 : i32 to vector<8x1xi32>
    %218 = arith.ori %216, %217 : vector<8x1xi32>
    %219 = vector.broadcast %218 : vector<8x1xi32> to vector<8x1024xi32>
    %220 = arith.cmpi sge, %6, %219 : vector<8x1024xi32>
    %221 = arith.extui %220 : vector<8x1024xi1> to vector<8x1024xi32>
    %cst_42 = arith.constant dense<0> : vector<8xi32>
    %222 = vector.multi_reduction <add>, %221, %cst_42 [1] : vector<8x1024xi32> to vector<8xi32>
    %223 = vector.shape_cast %222 : vector<8xi32> to vector<8x1xi32>
    %c256_i32_43 = arith.constant 256 : i32
    %224 = vector.broadcast %c256_i32_43 : i32 to vector<8x1xi32>
    %225 = arith.cmpi sge, %223, %224 : vector<8x1xi32>
    %226 = arith.select %225, %218, %216 : vector<8x1xi1>, vector<8x1xi32>
    %c512_i32 = arith.constant 512 : i32
    %227 = vector.broadcast %c512_i32 : i32 to vector<8x1xi32>
    %228 = arith.ori %226, %227 : vector<8x1xi32>
    %229 = vector.broadcast %228 : vector<8x1xi32> to vector<8x1024xi32>
    %230 = arith.cmpi sge, %6, %229 : vector<8x1024xi32>
    %231 = arith.extui %230 : vector<8x1024xi1> to vector<8x1024xi32>
    %cst_44 = arith.constant dense<0> : vector<8xi32>
    %232 = vector.multi_reduction <add>, %231, %cst_44 [1] : vector<8x1024xi32> to vector<8xi32>
    %233 = vector.shape_cast %232 : vector<8xi32> to vector<8x1xi32>
    %c256_i32_45 = arith.constant 256 : i32
    %234 = vector.broadcast %c256_i32_45 : i32 to vector<8x1xi32>
    %235 = arith.cmpi sge, %233, %234 : vector<8x1xi32>
    %236 = arith.select %235, %228, %226 : vector<8x1xi1>, vector<8x1xi32>
    %c256_i32_46 = arith.constant 256 : i32
    %237 = vector.broadcast %c256_i32_46 : i32 to vector<8x1xi32>
    %238 = arith.ori %236, %237 : vector<8x1xi32>
    %239 = vector.broadcast %238 : vector<8x1xi32> to vector<8x1024xi32>
    %240 = arith.cmpi sge, %6, %239 : vector<8x1024xi32>
    %241 = arith.extui %240 : vector<8x1024xi1> to vector<8x1024xi32>
    %cst_47 = arith.constant dense<0> : vector<8xi32>
    %242 = vector.multi_reduction <add>, %241, %cst_47 [1] : vector<8x1024xi32> to vector<8xi32>
    %243 = vector.shape_cast %242 : vector<8xi32> to vector<8x1xi32>
    %c256_i32_48 = arith.constant 256 : i32
    %244 = vector.broadcast %c256_i32_48 : i32 to vector<8x1xi32>
    %245 = arith.cmpi sge, %243, %244 : vector<8x1xi32>
    %246 = arith.select %245, %238, %236 : vector<8x1xi1>, vector<8x1xi32>
    %c128_i32 = arith.constant 128 : i32
    %247 = vector.broadcast %c128_i32 : i32 to vector<8x1xi32>
    %248 = arith.ori %246, %247 : vector<8x1xi32>
    %249 = vector.broadcast %248 : vector<8x1xi32> to vector<8x1024xi32>
    %250 = arith.cmpi sge, %6, %249 : vector<8x1024xi32>
    %251 = arith.extui %250 : vector<8x1024xi1> to vector<8x1024xi32>
    %cst_49 = arith.constant dense<0> : vector<8xi32>
    %252 = vector.multi_reduction <add>, %251, %cst_49 [1] : vector<8x1024xi32> to vector<8xi32>
    %253 = vector.shape_cast %252 : vector<8xi32> to vector<8x1xi32>
    %c256_i32_50 = arith.constant 256 : i32
    %254 = vector.broadcast %c256_i32_50 : i32 to vector<8x1xi32>
    %255 = arith.cmpi sge, %253, %254 : vector<8x1xi32>
    %256 = arith.select %255, %248, %246 : vector<8x1xi1>, vector<8x1xi32>
    %c64_i32 = arith.constant 64 : i32
    %257 = vector.broadcast %c64_i32 : i32 to vector<8x1xi32>
    %258 = arith.ori %256, %257 : vector<8x1xi32>
    %259 = vector.broadcast %258 : vector<8x1xi32> to vector<8x1024xi32>
    %260 = arith.cmpi sge, %6, %259 : vector<8x1024xi32>
    %261 = arith.extui %260 : vector<8x1024xi1> to vector<8x1024xi32>
    %cst_51 = arith.constant dense<0> : vector<8xi32>
    %262 = vector.multi_reduction <add>, %261, %cst_51 [1] : vector<8x1024xi32> to vector<8xi32>
    %263 = vector.shape_cast %262 : vector<8xi32> to vector<8x1xi32>
    %c256_i32_52 = arith.constant 256 : i32
    %264 = vector.broadcast %c256_i32_52 : i32 to vector<8x1xi32>
    %265 = arith.cmpi sge, %263, %264 : vector<8x1xi32>
    %266 = arith.select %265, %258, %256 : vector<8x1xi1>, vector<8x1xi32>
    %c32_i32 = arith.constant 32 : i32
    %267 = vector.broadcast %c32_i32 : i32 to vector<8x1xi32>
    %268 = arith.ori %266, %267 : vector<8x1xi32>
    %269 = vector.broadcast %268 : vector<8x1xi32> to vector<8x1024xi32>
    %270 = arith.cmpi sge, %6, %269 : vector<8x1024xi32>
    %271 = arith.extui %270 : vector<8x1024xi1> to vector<8x1024xi32>
    %cst_53 = arith.constant dense<0> : vector<8xi32>
    %272 = vector.multi_reduction <add>, %271, %cst_53 [1] : vector<8x1024xi32> to vector<8xi32>
    %273 = vector.shape_cast %272 : vector<8xi32> to vector<8x1xi32>
    %c256_i32_54 = arith.constant 256 : i32
    %274 = vector.broadcast %c256_i32_54 : i32 to vector<8x1xi32>
    %275 = arith.cmpi sge, %273, %274 : vector<8x1xi32>
    %276 = arith.select %275, %268, %266 : vector<8x1xi1>, vector<8x1xi32>
    %c16_i32 = arith.constant 16 : i32
    %277 = vector.broadcast %c16_i32 : i32 to vector<8x1xi32>
    %278 = arith.ori %276, %277 : vector<8x1xi32>
    %279 = vector.broadcast %278 : vector<8x1xi32> to vector<8x1024xi32>
    %280 = arith.cmpi sge, %6, %279 : vector<8x1024xi32>
    %281 = arith.extui %280 : vector<8x1024xi1> to vector<8x1024xi32>
    %cst_55 = arith.constant dense<0> : vector<8xi32>
    %282 = vector.multi_reduction <add>, %281, %cst_55 [1] : vector<8x1024xi32> to vector<8xi32>
    %283 = vector.shape_cast %282 : vector<8xi32> to vector<8x1xi32>
    %c256_i32_56 = arith.constant 256 : i32
    %284 = vector.broadcast %c256_i32_56 : i32 to vector<8x1xi32>
    %285 = arith.cmpi sge, %283, %284 : vector<8x1xi32>
    %286 = arith.select %285, %278, %276 : vector<8x1xi1>, vector<8x1xi32>
    %c8_i32 = arith.constant 8 : i32
    %287 = vector.broadcast %c8_i32 : i32 to vector<8x1xi32>
    %288 = arith.ori %286, %287 : vector<8x1xi32>
    %289 = vector.broadcast %288 : vector<8x1xi32> to vector<8x1024xi32>
    %290 = arith.cmpi sge, %6, %289 : vector<8x1024xi32>
    %291 = arith.extui %290 : vector<8x1024xi1> to vector<8x1024xi32>
    %cst_57 = arith.constant dense<0> : vector<8xi32>
    %292 = vector.multi_reduction <add>, %291, %cst_57 [1] : vector<8x1024xi32> to vector<8xi32>
    %293 = vector.shape_cast %292 : vector<8xi32> to vector<8x1xi32>
    %c256_i32_58 = arith.constant 256 : i32
    %294 = vector.broadcast %c256_i32_58 : i32 to vector<8x1xi32>
    %295 = arith.cmpi sge, %293, %294 : vector<8x1xi32>
    %296 = arith.select %295, %288, %286 : vector<8x1xi1>, vector<8x1xi32>
    %c4_i32 = arith.constant 4 : i32
    %297 = vector.broadcast %c4_i32 : i32 to vector<8x1xi32>
    %298 = arith.ori %296, %297 : vector<8x1xi32>
    %299 = vector.broadcast %298 : vector<8x1xi32> to vector<8x1024xi32>
    %300 = arith.cmpi sge, %6, %299 : vector<8x1024xi32>
    %301 = arith.extui %300 : vector<8x1024xi1> to vector<8x1024xi32>
    %cst_59 = arith.constant dense<0> : vector<8xi32>
    %302 = vector.multi_reduction <add>, %301, %cst_59 [1] : vector<8x1024xi32> to vector<8xi32>
    %303 = vector.shape_cast %302 : vector<8xi32> to vector<8x1xi32>
    %c256_i32_60 = arith.constant 256 : i32
    %304 = vector.broadcast %c256_i32_60 : i32 to vector<8x1xi32>
    %305 = arith.cmpi sge, %303, %304 : vector<8x1xi32>
    %306 = arith.select %305, %298, %296 : vector<8x1xi1>, vector<8x1xi32>
    %c2_i32 = arith.constant 2 : i32
    %307 = vector.broadcast %c2_i32 : i32 to vector<8x1xi32>
    %308 = arith.ori %306, %307 : vector<8x1xi32>
    %309 = vector.broadcast %308 : vector<8x1xi32> to vector<8x1024xi32>
    %310 = arith.cmpi sge, %6, %309 : vector<8x1024xi32>
    %311 = arith.extui %310 : vector<8x1024xi1> to vector<8x1024xi32>
    %cst_61 = arith.constant dense<0> : vector<8xi32>
    %312 = vector.multi_reduction <add>, %311, %cst_61 [1] : vector<8x1024xi32> to vector<8xi32>
    %313 = vector.shape_cast %312 : vector<8xi32> to vector<8x1xi32>
    %c256_i32_62 = arith.constant 256 : i32
    %314 = vector.broadcast %c256_i32_62 : i32 to vector<8x1xi32>
    %315 = arith.cmpi sge, %313, %314 : vector<8x1xi32>
    %316 = arith.select %315, %308, %306 : vector<8x1xi1>, vector<8x1xi32>
    %c1_i32 = arith.constant 1 : i32
    %317 = vector.broadcast %c1_i32 : i32 to vector<8x1xi32>
    %318 = arith.ori %316, %317 : vector<8x1xi32>
    %319 = vector.broadcast %318 : vector<8x1xi32> to vector<8x1024xi32>
    %320 = arith.cmpi sge, %6, %319 : vector<8x1024xi32>
    %321 = arith.extui %320 : vector<8x1024xi1> to vector<8x1024xi32>
    %cst_63 = arith.constant dense<0> : vector<8xi32>
    %322 = vector.multi_reduction <add>, %321, %cst_63 [1] : vector<8x1024xi32> to vector<8xi32>
    %323 = vector.shape_cast %322 : vector<8xi32> to vector<8x1xi32>
    %c256_i32_64 = arith.constant 256 : i32
    %324 = vector.broadcast %c256_i32_64 : i32 to vector<8x1xi32>
    %325 = arith.cmpi sge, %323, %324 : vector<8x1xi32>
    %326 = arith.select %325, %318, %316 : vector<8x1xi1>, vector<8x1xi32>
    %327 = vector.broadcast %326 : vector<8x1xi32> to vector<8x1024xi32>
    %328 = arith.cmpi sgt, %6, %327 : vector<8x1024xi32>
    %329 = arith.extui %328 : vector<8x1024xi1> to vector<8x1024xi32>
    %cst_65 = arith.constant dense<0> : vector<8xi32>
    %330 = vector.multi_reduction <add>, %329, %cst_65 [1] : vector<8x1024xi32> to vector<8xi32>
    %331 = vector.shape_cast %330 : vector<8xi32> to vector<8x1xi32>
    %cst_66 = arith.constant 0.000000e+00 : f32
    %332 = vector.broadcast %cst_66 : f32 to vector<8x1024xf32>
    %333 = arith.select %328, %0, %332 : vector<8x1024xi1>, vector<8x1024xf32>
    %cst_67 = arith.constant dense<0.000000e+00> : vector<8xf32>
    %334 = vector.multi_reduction <add>, %333, %cst_67 [1] : vector<8x1024xf32> to vector<8xf32>
    %335 = vector.shape_cast %334 : vector<8xf32> to vector<8x1xf32>
    %336 = vector.broadcast %326 : vector<8x1xi32> to vector<8x1024xi32>
    %337 = arith.cmpi eq, %6, %336 : vector<8x1024xi32>
    %cst_68 = arith.constant 0xFF800000 : f32
    %338 = vector.broadcast %cst_68 : f32 to vector<8x1024xf32>
    %339 = arith.select %337, %0, %338 : vector<8x1024xi1>, vector<8x1024xf32>
    %cst_69 = arith.constant dense<0xFF800000> : vector<8xf32>
    %340 = vector.multi_reduction <maximumf>, %339, %cst_69 [1] : vector<8x1024xf32> to vector<8xf32>
    %341 = vector.shape_cast %340 : vector<8xf32> to vector<8x1xf32>
    %342 = arith.sitofp %331 : vector<8x1xi32> to vector<8x1xf32>
    %cst_70 = arith.constant 2.560000e+02 : f32
    %343 = vector.broadcast %cst_70 : f32 to vector<8x1xf32>
    %344 = arith.subf %343, %342 : vector<8x1xf32>
    %345 = arith.mulf %344, %341 : vector<8x1xf32>
    %346 = arith.addf %335, %345 : vector<8x1xf32>
    %347 = vector.shape_cast %346 : vector<8x1xf32> to vector<8x1xf32>
    %348 = vector.broadcast %347 : vector<8x1xf32> to vector<8x128xf32>
    %c0_71 = arith.constant 0 : index
    %c0_72 = arith.constant 0 : index
    %349 = vector.load %arg2[%c0_71, %c0_72] : memref<8x128xf32, #tpu.memory_space<vmem>>, vector<8x128xf32>
    tpu.vector_store %arg2[%c0_71, %c0_72], %348 {strides = array<i32>} : memref<8x128xf32, #tpu.memory_space<vmem>>, vector<8x128xf32>,
    return
  }
  func.func @transform_0(%arg0: i32) -> (i32, i32) {
    %c0_i32 = arith.constant 0 : i32
    %c0_i32_0 = arith.constant 0 : i32
    return %arg0, %c0_i32 : i32, i32
  }
  func.func @transform_1(%arg0: i32) -> (i32, i32) {
    %c0_i32 = arith.constant 0 : i32
    %c0_i32_0 = arith.constant 0 : i32
    return %arg0, %c0_i32 : i32, i32
  }
}

</mosaic_0001>

<bundles_post_ra>
// kernel: tpu_custom_call.1
= control target key start
LH: loop header
LB: loop body
LE: loop exit
PB: predicated region body
PF: predicated region fallthrough
CT: control target
= control target key end

     0   :  { %6 = vsyncpa [#allocation3], 0  ;;  %s2100_s0 = inlined_call_operand.hbm [shape: f32[8,1024], index: 0, kind: input, shape index: {}]   ;;  %s2101_s1 = inlined_call_operand.hbm [shape: f32[8,128], index: 1, kind: output, shape index: {}]  }
   0x1   :  { %7 = vsyncpa [#allocation4], 0  ;;  %s1433_s6 = smov [#allocation2]   ;;  %s1385_s10 = scalar_lea.hbm %s2100_s0, 1024 }
   0x2   :  { %s14_s7 = sshll.u32 %s1433_s6, 4  ;;  %p1386_p0 = scmp.ne.s32.totalorder %s2100_s0, %s1385_s10  ;;  %s15_s7 = int_to_ptr.vmem [resolvable:$true] %s14_s7 }
   0x3   :  { %p1389_p1 = scmp.lt.u32.totalorder %s1385_s10, %s2100_s0 }
   0x5   :  { %p1391_p2 = pnand %p1389_p1, %p1386_p0 }
   0x7   :  { %1394 = shalt.err (!%p1391_p2)
}
   0x8   :  { %s1395_s15 = scalar_lea.vmem %s15_s7, 1024  ;;  %p1400_p4 = scmp.lt.s32.totalorder %s15_s7, %s15_s7 }
   0x9   :  { %p1396_p3 = scmp.ne.s32.totalorder %s15_s7, %s1395_s15  ;;  %p1401_p5 = scmp.lt.s32.totalorder %s1395_s15, %s1395_s15 }
   0xb   :  { %p1402_p6 = por %p1401_p5, %p1400_p4 }
   0xd   :  { %p1403_p7 = pnand %p1402_p6, %p1396_p3 }
   0xf   :  { %1406 = shalt.err (!%p1403_p7)
}
  0x10   :  { %17 = dma.hbm_to_vmem [thread:$0]  %s2100_s0, 1024, %s15_s7, [#allocation3]  }
  0x11   :  { %1429 = dma.done.wait [#allocation3], 1024  }
  0x12   :  { %1430 = vsyncadd [#allocation3], 4294966272  ;;  %v21_v0 = vld [vmem:[#allocation2] sm:$0xff]  ;;  %v22_v1 = vld [vmem:[#allocation2 + $0x8] sm:$0xff]  ;;  %v1434_v24 = vmov 0   ;;  %v1435_v50 = vmov 2147483648  }
  0x13   :  { %v23_v2 = vld [vmem:[#allocation2 + $0x10] sm:$0xff]  ;;  %v24_v3 = vld [vmem:[#allocation2 + $0x18] sm:$0xff]  ;;  %v25_v4 = vld [vmem:[#allocation2 + $0x20] sm:$0xff]  ;;  %vm37_vm0 = vcmp.lt.s32.totalorder %v21_v0, 0  ;;  %vm38_vm1 = vcmp.lt.s32.totalorder %v22_v1, 0  ;;  %s1436_s0 = smov [#allocation5]  }
  0x14   :  { %v26_v5 = vld [vmem:[#allocation2 + $0x28] sm:$0xff]  ;;  %v27_v6 = vld [vmem:[#allocation2 + $0x30] sm:$0xff]  ;;  %v28_v7 = vld [vmem:[#allocation2 + $0x38] sm:$0xff]  ;;  %vm39_vm2 = vcmp.lt.s32.totalorder %v23_v2, 0  ;;  %vm40_vm3 = vcmp.lt.s32.totalorder %v24_v3, 0  ;;  %vm41_vm4 = vcmp.lt.s32.totalorder %v25_v4, 0 }
  0x15   :  { %vm42_vm5 = vcmp.lt.s32.totalorder %v26_v5, 0  ;;  %vm43_vm6 = vcmp.lt.s32.totalorder %v27_v6, 0  ;;  %vm44_vm7 = vcmp.lt.s32.totalorder %v28_v7, 0  ;;  %v45_v8 = vxor.u32 2147483647, %v21_v0  ;;  %s1364_s18 = sshll.u32 %s1436_s0, 4  ;;  %s1365_s18 = int_to_ptr.vmem [resolvable:$true] %s1364_s18 }
  0x16   :  { %v46_v9 = vxor.u32 2147483647, %v22_v1  ;;  %v47_v10 = vxor.u32 2147483647, %v23_v2  ;;  %v48_v11 = vxor.u32 2147483647, %v24_v3  ;;  %p1412_p9 = scmp.lt.s32.totalorder %s1365_s18, %s1365_s18 }
  0x17   :  { %v49_v12 = vxor.u32 2147483647, %v25_v4  ;;  %v50_v13 = vxor.u32 2147483647, %v26_v5  ;;  %v51_v14 = vxor.u32 2147483647, %v27_v6  ;;  %v1460_v16 = vsel %vm37_vm0, %v45_v8, %v21_v0 }
  0x18   :  { %v52_v15 = vxor.u32 2147483647, %v28_v7  ;;  %v1463_v17 = vsel %vm38_vm1, %v46_v9, %v22_v1  ;;  %v1466_v18 = vsel %vm39_vm2, %v47_v10, %v23_v2  ;;  %v1469_v19 = vsel %vm40_vm3, %v48_v11, %v24_v3  ;;  %s1407_s19 = scalar_lea.vmem %s1365_s18, 128 }
  0x19   :  { %v1472_v20 = vsel %vm41_vm4, %v49_v12, %v25_v4  ;;  %v1475_v21 = vsel %vm42_vm5, %v50_v13, %v26_v5  ;;  %v1478_v22 = vsel %vm43_vm6, %v51_v14, %v27_v6  ;;  %vm61_vm8 = vcmp.ge.s32.totalorder %v1460_v16, 0  ;;  %p1408_p8 = scmp.ne.s32.totalorder %s1365_s18, %s1407_s19  ;;  %p1413_p10 = scmp.lt.s32.totalorder %s1407_s19, %s1407_s19 }
  0x1a   :  { %v1481_v23 = vsel %vm44_vm7, %v52_v15, %v28_v7  ;;  %vm62_vm9 = vcmp.ge.s32.totalorder %v1463_v17, 0  ;;  %vm63_vm10 = vcmp.ge.s32.totalorder %v1466_v18, 0  ;;  %vm64_vm11 = vcmp.ge.s32.totalorder %v1469_v19, 0 }
  0x1b   :  { %vm65_vm12 = vcmp.ge.s32.totalorder %v1472_v20, 0  ;;  %vm66_vm13 = vcmp.ge.s32.totalorder %v1475_v21, 0  ;;  %vm67_vm14 = vcmp.ge.s32.totalorder %v1478_v22, 0  ;;  %vm68_vm15 = vcmp.ge.s32.totalorder %v1481_v23, 0  ;;  %p1414_p11 = por %p1413_p10, %p1412_p9 }
  0x1c   :  { %v69_v25 = vsel %vm61_vm8, 1, %v1434_v24  ;;  %v70_v26 = vsel %vm62_vm9, 1, %v1434_v24  ;;  %v71_v27 = vsel %vm63_vm10, 1, %v1434_v24  ;;  %v72_v28 = vsel %vm64_vm11, 1, %v1434_v24 }
  0x1d   :  { %v73_v29 = vsel %vm65_vm12, 1, %v1434_v24  ;;  %v74_v30 = vsel %vm66_vm13, 1, %v1434_v24  ;;  %v75_v31 = vsel %vm67_vm14, 1, %v1434_v24  ;;  %v76_v32 = vsel %vm68_vm15, 1, %v1434_v24  ;;  %p1415_p12 = pnand %p1414_p11, %p1408_p8 }
  0x1e   :  { %v77_v33 = vadd.s32 %v73_v29, %v69_v25  ;;  %v78_v34 = vadd.s32 %v74_v30, %v70_v26  ;;  %v79_v35 = vadd.s32 %v75_v31, %v71_v27  ;;  %v80_v36 = vadd.s32 %v76_v32, %v72_v28 }
  0x20   :  { %v81_v37 = vadd.s32 %v78_v34, %v77_v33  ;;  %v82_v38 = vadd.s32 %v80_v36, %v79_v35 }
  0x22   :  { %v83_v39 = vadd.s32 %v82_v38, %v81_v37 }
  0x24   :  { %v85_v40 = vshrl.u32 %v83_v39, 16  ;;  %v84_v41 = vand.u32 65535, %v83_v39 }
  0x26   :  { %v87_v42 = vcvt.s32.f32 %v85_v40  ;;  %v86_v43 = vcvt.s32.f32 %v84_v41 }
  0x28   :  { %90 = vadd.xlane.f32.xlu0 %v87_v42 }
  0x2c   :  { %88 = vadd.xlane.f32.xlu0 %v86_v43 }
  0xb5   :  { %v91_v44 = vpop.xlane.xlu0 %90 }
  0xb6   :  { %v93_v45 = vcvt.f32.s32 %v91_v44 }
  0xb8   :  { %v94_v47 = vshll.u32 %v93_v45, 16 }
  0xb9   :  { %v89_v46 = vpop.xlane.xlu0 %88 }
  0xba   :  { %v92_v48 = vcvt.f32.s32 %v89_v46 }
  0xbc   :  { %v95_v49 = vadd.s32 %v94_v47, %v92_v48 }
  0xbe   :  { %vm96_vm0 = vcmp.ge.s32.totalorder %v95_v49, 256 }
  0xbf   :  { %v97_v51 = vsel %vm96_vm0, 0, %v1435_v50 }
  0xc0   :  { %v98_v52 = vor.u32 1073741824, %v97_v51 }
  0xc2   :  { %vm99_vm1 = vcmp.ge.s32.totalorder %v1460_v16, %v98_v52  ;;  %vm100_vm2 = vcmp.ge.s32.totalorder %v1463_v17, %v98_v52  ;;  %vm101_vm3 = vcmp.ge.s32.totalorder %v1466_v18, %v98_v52  ;;  %vm102_vm4 = vcmp.ge.s32.totalorder %v1469_v19, %v98_v52 }
  0xc3   :  { %vm103_vm5 = vcmp.ge.s32.totalorder %v1472_v20, %v98_v52  ;;  %vm104_vm6 = vcmp.ge.s32.totalorder %v1475_v21, %v98_v52  ;;  %vm105_vm7 = vcmp.ge.s32.totalorder %v1478_v22, %v98_v52  ;;  %vm106_vm8 = vcmp.ge.s32.totalorder %v1481_v23, %v98_v52 }
  0xc4   :  { %v107_v53 = vsel %vm99_vm1, 1, %v1434_v24  ;;  %v108_v54 = vsel %vm100_vm2, 1, %v1434_v24  ;;  %v109_v55 = vsel %vm101_vm3, 1, %v1434_v24  ;;  %v110_v56 = vsel %vm102_vm4, 1, %v1434_v24 }
  0xc5   :  { %v111_v57 = vsel %vm103_vm5, 1, %v1434_v24  ;;  %v112_v58 = vsel %vm104_vm6, 1, %v1434_v24  ;;  %v113_v59 = vsel %vm105_vm7, 1, %v1434_v24  ;;  %v114_v60 = vsel %vm106_vm8, 1, %v1434_v24 }
  0xc6   :  { %v115_v61 = vadd.s32 %v111_v57, %v107_v53  ;;  %v116_v62 = vadd.s32 %v112_v58, %v108_v54  ;;  %v117_v63 = vadd.s32 %v113_v59, %v109_v55  ;;  %v118_v0 = vadd.s32 %v114_v60, %v110_v56 }
  0xc8   :  { %v119_v1 = vadd.s32 %v116_v62, %v115_v61  ;;  %v120_v2 = vadd.s32 %v118_v0, %v117_v63 }
  0xca   :  { %v121_v3 = vadd.s32 %v120_v2, %v119_v1 }
  0xcc   :  { %v123_v4 = vshrl.u32 %v121_v3, 16  ;;  %v122_v6 = vand.u32 65535, %v121_v3 }
  0xce   :  { %v125_v5 = vcvt.s32.f32 %v123_v4  ;;  %v124_v7 = vcvt.s32.f32 %v122_v6 }
  0xd0   :  { %128 = vadd.xlane.f32.xlu1 %v125_v5 }
  0xd4   :  { %126 = vadd.xlane.f32.xlu1 %v124_v7 }
 0x15d   :  { %v129_v8 = vpop.xlane.xlu1 %128 }
 0x15e   :  { %v131_v9 = vcvt.f32.s32 %v129_v8 }
 0x160   :  { %v132_v11 = vshll.u32 %v131_v9, 16 }
 0x161   :  { %v127_v10 = vpop.xlane.xlu1 %126 }
 0x162   :  { %v130_v12 = vcvt.f32.s32 %v127_v10 }
 0x164   :  { %v133_v13 = vadd.s32 %v132_v11, %v130_v12 }
 0x166   :  { %vm134_vm9 = vcmp.ge.s32.totalorder %v133_v13, 256 }
 0x167   :  { %v135_v14 = vsel %vm134_vm9, %v98_v52, %v97_v51 }
 0x168   :  { %v136_v15 = vor.u32 536870912, %v135_v14 }
 0x16a   :  { %vm137_vm10 = vcmp.ge.s32.totalorder %v1460_v16, %v136_v15  ;;  %vm138_vm11 = vcmp.ge.s32.totalorder %v1463_v17, %v136_v15  ;;  %vm139_vm12 = vcmp.ge.s32.totalorder %v1466_v18, %v136_v15  ;;  %vm140_vm13 = vcmp.ge.s32.totalorder %v1469_v19, %v136_v15 }
 0x16b   :  { %vm141_vm14 = vcmp.ge.s32.totalorder %v1472_v20, %v136_v15  ;;  %vm142_vm15 = vcmp.ge.s32.totalorder %v1475_v21, %v136_v15  ;;  %vm143_vm0 = vcmp.ge.s32.totalorder %v1478_v22, %v136_v15  ;;  %vm144_vm1 = vcmp.ge.s32.totalorder %v1481_v23, %v136_v15 }
 0x16c   :  { %v145_v25 = vsel %vm137_vm10, 1, %v1434_v24  ;;  %v146_v26 = vsel %vm138_vm11, 1, %v1434_v24  ;;  %v147_v27 = vsel %vm139_vm12, 1, %v1434_v24  ;;  %v148_v28 = vsel %vm140_vm13, 1, %v1434_v24 }
 0x16d   :  { %v149_v29 = vsel %vm141_vm14, 1, %v1434_v24  ;;  %v150_v30 = vsel %vm142_vm15, 1, %v1434_v24  ;;  %v151_v31 = vsel %vm143_vm0, 1, %v1434_v24  ;;  %v152_v32 = vsel %vm144_vm1, 1, %v1434_v24 }
 0x16e   :  { %v153_v33 = vadd.s32 %v149_v29, %v145_v25  ;;  %v154_v34 = vadd.s32 %v150_v30, %v146_v26  ;;  %v155_v35 = vadd.s32 %v151_v31, %v147_v27  ;;  %v156_v36 = vadd.s32 %v152_v32, %v148_v28 }
 0x170   :  { %v157_v37 = vadd.s32 %v154_v34, %v153_v33  ;;  %v158_v38 = vadd.s32 %v156_v36, %v155_v35 }
 0x172   :  { %v159_v39 = vadd.s32 %v158_v38, %v157_v37 }
 0x174   :  { %v161_v40 = vshrl.u32 %v159_v39, 16  ;;  %v160_v41 = vand.u32 65535, %v159_v39 }
 0x176   :  { %v163_v42 = vcvt.s32.f32 %v161_v40  ;;  %v162_v43 = vcvt.s32.f32 %v160_v41 }
 0x178   :  { %166 = vadd.xlane.f32.xlu0 %v163_v42  ;;  %164 = vadd.xlane.f32.xlu1 %v162_v43 }
 0x205   :  { %v167_v44 = vpop.xlane.xlu0 %166  ;;  %v165_v45 = vpop.xlane.xlu1 %164 }
 0x206   :  { %v169_v46 = vcvt.f32.s32 %v167_v44  ;;  %v168_v48 = vcvt.f32.s32 %v165_v45 }
 0x208   :  { %v170_v47 = vshll.u32 %v169_v46, 16 }
 0x20a   :  { %v171_v49 = vadd.s32 %v170_v47, %v168_v48 }
 0x20c   :  { %vm172_vm2 = vcmp.ge.s32.totalorder %v171_v49, 256 }
 0x20d   :  { %v173_v50 = vsel %vm172_vm2, %v136_v15, %v135_v14 }
 0x20e   :  { %v174_v51 = vor.u32 268435456, %v173_v50 }
 0x210   :  { %vm175_vm3 = vcmp.ge.s32.totalorder %v1460_v16, %v174_v51  ;;  %vm176_vm4 = vcmp.ge.s32.totalorder %v1463_v17, %v174_v51  ;;  %vm177_vm5 = vcmp.ge.s32.totalorder %v1466_v18, %v174_v51  ;;  %vm178_vm6 = vcmp.ge.s32.totalorder %v1469_v19, %v174_v51 }
 0x211   :  { %vm179_vm7 = vcmp.ge.s32.totalorder %v1472_v20, %v174_v51  ;;  %vm180_vm8 = vcmp.ge.s32.totalorder %v1475_v21, %v174_v51  ;;  %vm181_vm9 = vcmp.ge.s32.totalorder %v1478_v22, %v174_v51  ;;  %vm182_vm10 = vcmp.ge.s32.totalorder %v1481_v23, %v174_v51 }
 0x212   :  { %v183_v52 = vsel %vm175_vm3, 1, %v1434_v24  ;;  %v184_v53 = vsel %vm176_vm4, 1, %v1434_v24  ;;  %v185_v54 = vsel %vm177_vm5, 1, %v1434_v24  ;;  %v186_v55 = vsel %vm178_vm6, 1, %v1434_v24 }
 0x213   :  { %v187_v56 = vsel %vm179_vm7, 1, %v1434_v24  ;;  %v188_v57 = vsel %vm180_vm8, 1, %v1434_v24  ;;  %v189_v58 = vsel %vm181_vm9, 1, %v1434_v24  ;;  %v190_v59 = vsel %vm182_vm10, 1, %v1434_v24 }
 0x214   :  { %v191_v60 = vadd.s32 %v187_v56, %v183_v52  ;;  %v192_v61 = vadd.s32 %v188_v57, %v184_v53  ;;  %v193_v62 = vadd.s32 %v189_v58, %v185_v54  ;;  %v194_v63 = vadd.s32 %v190_v59, %v186_v55 }
 0x216   :  { %v195_v0 = vadd.s32 %v192_v61, %v191_v60  ;;  %v196_v1 = vadd.s32 %v194_v63, %v193_v62 }
 0x218   :  { %v197_v2 = vadd.s32 %v196_v1, %v195_v0 }
 0x21a   :  { %v199_v3 = vshrl.u32 %v197_v2, 16  ;;  %v198_v4 = vand.u32 65535, %v197_v2 }
 0x21c   :  { %v201_v5 = vcvt.s32.f32 %v199_v3  ;;  %v200_v6 = vcvt.s32.f32 %v198_v4 }
 0x21e   :  { %204 = vadd.xlane.f32.xlu0 %v201_v5  ;;  %202 = vadd.xlane.f32.xlu1 %v200_v6 }
 0x2ab   :  { %v205_v7 = vpop.xlane.xlu0 %204  ;;  %v203_v8 = vpop.xlane.xlu1 %202 }
 0x2ac   :  { %v207_v9 = vcvt.f32.s32 %v205_v7  ;;  %v206_v11 = vcvt.f32.s32 %v203_v8 }
 0x2ae   :  { %v208_v10 = vshll.u32 %v207_v9, 16 }
 0x2b0   :  { %v209_v12 = vadd.s32 %v208_v10, %v206_v11 }
 0x2b2   :  { %vm210_vm11 = vcmp.ge.s32.totalorder %v209_v12, 256 }
 0x2b3   :  { %v211_v13 = vsel %vm210_vm11, %v174_v51, %v173_v50 }
 0x2b4   :  { %v212_v14 = vor.u32 134217728, %v211_v13 }
 0x2b6   :  { %vm213_vm12 = vcmp.ge.s32.totalorder %v1460_v16, %v212_v14  ;;  %vm214_vm13 = vcmp.ge.s32.totalorder %v1463_v17, %v212_v14  ;;  %vm215_vm14 = vcmp.ge.s32.totalorder %v1466_v18, %v212_v14  ;;  %vm216_vm15 = vcmp.ge.s32.totalorder %v1469_v19, %v212_v14 }
 0x2b7   :  { %vm217_vm0 = vcmp.ge.s32.totalorder %v1472_v20, %v212_v14  ;;  %vm218_vm1 = vcmp.ge.s32.totalorder %v1475_v21, %v212_v14  ;;  %vm219_vm2 = vcmp.ge.s32.totalorder %v1478_v22, %v212_v14  ;;  %vm220_vm3 = vcmp.ge.s32.totalorder %v1481_v23, %v212_v14 }
 0x2b8   :  { %v221_v15 = vsel %vm213_vm12, 1, %v1434_v24  ;;  %v222_v25 = vsel %vm214_vm13, 1, %v1434_v24  ;;  %v223_v26 = vsel %vm215_vm14, 1, %v1434_v24  ;;  %v224_v27 = vsel %vm216_vm15, 1, %v1434_v24 }
 0x2b9   :  { %v225_v28 = vsel %vm217_vm0, 1, %v1434_v24  ;;  %v226_v29 = vsel %vm218_vm1, 1, %v1434_v24  ;;  %v227_v30 = vsel %vm219_vm2, 1, %v1434_v24  ;;  %v228_v31 = vsel %vm220_vm3, 1, %v1434_v24 }
 0x2ba   :  { %v229_v32 = vadd.s32 %v225_v28, %v221_v15  ;;  %v230_v33 = vadd.s32 %v226_v29, %v222_v25  ;;  %v231_v34 = vadd.s32 %v227_v30, %v223_v26  ;;  %v232_v35 = vadd.s32 %v228_v31, %v224_v27 }
 0x2bc   :  { %v233_v36 = vadd.s32 %v230_v33, %v229_v32  ;;  %v234_v37 = vadd.s32 %v232_v35, %v231_v34 }
 0x2be   :  { %v235_v38 = vadd.s32 %v234_v37, %v233_v36 }
 0x2c0   :  { %v237_v39 = vshrl.u32 %v235_v38, 16  ;;  %v236_v40 = vand.u32 65535, %v235_v38 }
 0x2c2   :  { %v239_v41 = vcvt.s32.f32 %v237_v39  ;;  %v238_v42 = vcvt.s32.f32 %v236_v40 }
 0x2c4   :  { %242 = vadd.xlane.f32.xlu0 %v239_v41  ;;  %240 = vadd.xlane.f32.xlu1 %v238_v42 }
 0x351   :  { %v243_v43 = vpop.xlane.xlu0 %242  ;;  %v241_v44 = vpop.xlane.xlu1 %240 }
 0x352   :  { %v245_v45 = vcvt.f32.s32 %v243_v43  ;;  %v244_v47 = vcvt.f32.s32 %v241_v44 }
 0x354   :  { %v246_v46 = vshll.u32 %v245_v45, 16 }
 0x356   :  { %v247_v48 = vadd.s32 %v246_v46, %v244_v47 }
 0x358   :  { %vm248_vm4 = vcmp.ge.s32.totalorder %v247_v48, 256 }
 0x359   :  { %v249_v49 = vsel %vm248_vm4, %v212_v14, %v211_v13 }
 0x35a   :  { %v250_v50 = vor.u32 67108864, %v249_v49 }
 0x35c   :  { %vm251_vm5 = vcmp.ge.s32.totalorder %v1460_v16, %v250_v50  ;;  %vm252_vm6 = vcmp.ge.s32.totalorder %v1463_v17, %v250_v50  ;;  %vm253_vm7 = vcmp.ge.s32.totalorder %v1466_v18, %v250_v50  ;;  %vm254_vm8 = vcmp.ge.s32.totalorder %v1469_v19, %v250_v50 }
 0x35d   :  { %vm255_vm9 = vcmp.ge.s32.totalorder %v1472_v20, %v250_v50  ;;  %vm256_vm10 = vcmp.ge.s32.totalorder %v1475_v21, %v250_v50  ;;  %vm257_vm11 = vcmp.ge.s32.totalorder %v1478_v22, %v250_v50  ;;  %vm258_vm12 = vcmp.ge.s32.totalorder %v1481_v23, %v250_v50 }
 0x35e   :  { %v259_v51 = vsel %vm251_vm5, 1, %v1434_v24  ;;  %v260_v52 = vsel %vm252_vm6, 1, %v1434_v24  ;;  %v261_v53 = vsel %vm253_vm7, 1, %v1434_v24  ;;  %v262_v54 = vsel %vm254_vm8, 1, %v1434_v24 }
 0x35f   :  { %v263_v55 = vsel %vm255_vm9, 1, %v1434_v24  ;;  %v264_v56 = vsel %vm256_vm10, 1, %v1434_v24  ;;  %v265_v57 = vsel %vm257_vm11, 1, %v1434_v24  ;;  %v266_v58 = vsel %vm258_vm12, 1, %v1434_v24 }
 0x360   :  { %v267_v59 = vadd.s32 %v263_v55, %v259_v51  ;;  %v268_v60 = vadd.s32 %v264_v56, %v260_v52  ;;  %v269_v61 = vadd.s32 %v265_v57, %v261_v53  ;;  %v270_v62 = vadd.s32 %v266_v58, %v262_v54 }
 0x362   :  { %v271_v63 = vadd.s32 %v268_v60, %v267_v59  ;;  %v272_v0 = vadd.s32 %v270_v62, %v269_v61 }
 0x364   :  { %v273_v1 = vadd.s32 %v272_v0, %v271_v63 }
 0x366   :  { %v275_v2 = vshrl.u32 %v273_v1, 16  ;;  %v274_v3 = vand.u32 65535, %v273_v1 }
 0x368   :  { %v277_v4 = vcvt.s32.f32 %v275_v2  ;;  %v276_v5 = vcvt.s32.f32 %v274_v3 }
 0x36a   :  { %280 = vadd.xlane.f32.xlu0 %v277_v4  ;;  %278 = vadd.xlane.f32.xlu1 %v276_v5 }
 0x3f7   :  { %v281_v6 = vpop.xlane.xlu0 %280  ;;  %v279_v7 = vpop.xlane.xlu1 %278 }
 0x3f8   :  { %v283_v8 = vcvt.f32.s32 %v281_v6  ;;  %v282_v10 = vcvt.f32.s32 %v279_v7 }
 0x3fa   :  { %v284_v9 = vshll.u32 %v283_v8, 16 }
 0x3fc   :  { %v285_v11 = vadd.s32 %v284_v9, %v282_v10 }
 0x3fe   :  { %vm286_vm13 = vcmp.ge.s32.totalorder %v285_v11, 256 }
 0x3ff   :  { %v287_v12 = vsel %vm286_vm13, %v250_v50, %v249_v49 }
 0x400   :  { %v288_v13 = vor.u32 33554432, %v287_v12 }
 0x402   :  { %vm289_vm14 = vcmp.ge.s32.totalorder %v1460_v16, %v288_v13  ;;  %vm290_vm15 = vcmp.ge.s32.totalorder %v1463_v17, %v288_v13  ;;  %vm291_vm0 = vcmp.ge.s32.totalorder %v1466_v18, %v288_v13  ;;  %vm292_vm1 = vcmp.ge.s32.totalorder %v1469_v19, %v288_v13 }
 0x403   :  { %vm293_vm2 = vcmp.ge.s32.totalorder %v1472_v20, %v288_v13  ;;  %vm294_vm3 = vcmp.ge.s32.totalorder %v1475_v21, %v288_v13  ;;  %vm295_vm4 = vcmp.ge.s32.totalorder %v1478_v22, %v288_v13  ;;  %vm296_vm5 = vcmp.ge.s32.totalorder %v1481_v23, %v288_v13 }
 0x404   :  { %v297_v14 = vsel %vm289_vm14, 1, %v1434_v24  ;;  %v298_v15 = vsel %vm290_vm15, 1, %v1434_v24  ;;  %v299_v25 = vsel %vm291_vm0, 1, %v1434_v24  ;;  %v300_v26 = vsel %vm292_vm1, 1, %v1434_v24 }
 0x405   :  { %v301_v27 = vsel %vm293_vm2, 1, %v1434_v24  ;;  %v302_v28 = vsel %vm294_vm3, 1, %v1434_v24  ;;  %v303_v29 = vsel %vm295_vm4, 1, %v1434_v24  ;;  %v304_v30 = vsel %vm296_vm5, 1, %v1434_v24 }
 0x406   :  { %v305_v31 = vadd.s32 %v301_v27, %v297_v14  ;;  %v306_v32 = vadd.s32 %v302_v28, %v298_v15  ;;  %v307_v33 = vadd.s32 %v303_v29, %v299_v25  ;;  %v308_v34 = vadd.s32 %v304_v30, %v300_v26 }
 0x408   :  { %v309_v35 = vadd.s32 %v306_v32, %v305_v31  ;;  %v310_v36 = vadd.s32 %v308_v34, %v307_v33 }
 0x40a   :  { %v311_v37 = vadd.s32 %v310_v36, %v309_v35 }
 0x40c   :  { %v313_v38 = vshrl.u32 %v311_v37, 16  ;;  %v312_v39 = vand.u32 65535, %v311_v37 }
 0x40e   :  { %v315_v40 = vcvt.s32.f32 %v313_v38  ;;  %v314_v41 = vcvt.s32.f32 %v312_v39 }
 0x410   :  { %318 = vadd.xlane.f32.xlu0 %v315_v40  ;;  %316 = vadd.xlane.f32.xlu1 %v314_v41 }
 0x49d   :  { %v319_v42 = vpop.xlane.xlu0 %318  ;;  %v317_v43 = vpop.xlane.xlu1 %316 }
 0x49e   :  { %v321_v44 = vcvt.f32.s32 %v319_v42  ;;  %v320_v46 = vcvt.f32.s32 %v317_v43 }
 0x4a0   :  { %v322_v45 = vshll.u32 %v321_v44, 16 }
 0x4a2   :  { %v323_v47 = vadd.s32 %v322_v45, %v320_v46 }
 0x4a4   :  { %vm324_vm6 = vcmp.ge.s32.totalorder %v323_v47, 256 }
 0x4a5   :  { %v325_v48 = vsel %vm324_vm6, %v288_v13, %v287_v12 }
 0x4a6   :  { %v326_v49 = vor.u32 16777216, %v325_v48 }
 0x4a8   :  { %vm327_vm7 = vcmp.ge.s32.totalorder %v1460_v16, %v326_v49  ;;  %vm328_vm8 = vcmp.ge.s32.totalorder %v1463_v17, %v326_v49  ;;  %vm329_vm9 = vcmp.ge.s32.totalorder %v1466_v18, %v326_v49  ;;  %vm330_vm10 = vcmp.ge.s32.totalorder %v1469_v19, %v326_v49 }
 0x4a9   :  { %vm331_vm11 = vcmp.ge.s32.totalorder %v1472_v20, %v326_v49  ;;  %vm332_vm12 = vcmp.ge.s32.totalorder %v1475_v21, %v326_v49  ;;  %vm333_vm13 = vcmp.ge.s32.totalorder %v1478_v22, %v326_v49  ;;  %vm334_vm14 = vcmp.ge.s32.totalorder %v1481_v23, %v326_v49 }
 0x4aa   :  { %v335_v50 = vsel %vm327_vm7, 1, %v1434_v24  ;;  %v336_v51 = vsel %vm328_vm8, 1, %v1434_v24  ;;  %v337_v52 = vsel %vm329_vm9, 1, %v1434_v24  ;;  %v338_v53 = vsel %vm330_vm10, 1, %v1434_v24 }
 0x4ab   :  { %v339_v54 = vsel %vm331_vm11, 1, %v1434_v24  ;;  %v340_v55 = vsel %vm332_vm12, 1, %v1434_v24  ;;  %v341_v56 = vsel %vm333_vm13, 1, %v1434_v24  ;;  %v342_v57 = vsel %vm334_vm14, 1, %v1434_v24 }
 0x4ac   :  { %v343_v58 = vadd.s32 %v339_v54, %v335_v50  ;;  %v344_v59 = vadd.s32 %v340_v55, %v336_v51  ;;  %v345_v60 = vadd.s32 %v341_v56, %v337_v52  ;;  %v346_v61 = vadd.s32 %v342_v57, %v338_v53 }
 0x4ae   :  { %v347_v62 = vadd.s32 %v344_v59, %v343_v58  ;;  %v348_v63 = vadd.s32 %v346_v61, %v345_v60 }
 0x4b0   :  { %v349_v0 = vadd.s32 %v348_v63, %v347_v62 }
 0x4b2   :  { %v351_v1 = vshrl.u32 %v349_v0, 16  ;;  %v350_v2 = vand.u32 65535, %v349_v0 }
 0x4b4   :  { %v353_v3 = vcvt.s32.f32 %v351_v1  ;;  %v352_v4 = vcvt.s32.f32 %v350_v2 }
 0x4b6   :  { %356 = vadd.xlane.f32.xlu0 %v353_v3  ;;  %354 = vadd.xlane.f32.xlu1 %v352_v4 }
 0x543   :  { %v357_v5 = vpop.xlane.xlu0 %356  ;;  %v355_v6 = vpop.xlane.xlu1 %354 }
 0x544   :  { %v359_v7 = vcvt.f32.s32 %v357_v5  ;;  %v358_v9 = vcvt.f32.s32 %v355_v6 }
 0x546   :  { %v360_v8 = vshll.u32 %v359_v7, 16 }
 0x548   :  { %v361_v10 = vadd.s32 %v360_v8, %v358_v9 }
 0x54a   :  { %vm362_vm15 = vcmp.ge.s32.totalorder %v361_v10, 256 }
 0x54b   :  { %v363_v11 = vsel %vm362_vm15, %v326_v49, %v325_v48 }
 0x54c   :  { %v364_v12 = vor.u32 8388608, %v363_v11 }
 0x54e   :  { %vm365_vm0 = vcmp.ge.s32.totalorder %v1460_v16, %v364_v12  ;;  %vm366_vm1 = vcmp.ge.s32.totalorder %v1463_v17, %v364_v12  ;;  %vm367_vm2 = vcmp.ge.s32.totalorder %v1466_v18, %v364_v12  ;;  %vm368_vm3 = vcmp.ge.s32.totalorder %v1469_v19, %v364_v12 }
 0x54f   :  { %vm369_vm4 = vcmp.ge.s32.totalorder %v1472_v20, %v364_v12  ;;  %vm370_vm5 = vcmp.ge.s32.totalorder %v1475_v21, %v364_v12  ;;  %vm371_vm6 = vcmp.ge.s32.totalorder %v1478_v22, %v364_v12  ;;  %vm372_vm7 = vcmp.ge.s32.totalorder %v1481_v23, %v364_v12 }
 0x550   :  { %v373_v13 = vsel %vm365_vm0, 1, %v1434_v24  ;;  %v374_v14 = vsel %vm366_vm1, 1, %v1434_v24  ;;  %v375_v15 = vsel %vm367_vm2, 1, %v1434_v24  ;;  %v376_v25 = vsel %vm368_vm3, 1, %v1434_v24 }
 0x551   :  { %v377_v26 = vsel %vm369_vm4, 1, %v1434_v24  ;;  %v378_v27 = vsel %vm370_vm5, 1, %v1434_v24  ;;  %v379_v28 = vsel %vm371_vm6, 1, %v1434_v24  ;;  %v380_v29 = vsel %vm372_vm7, 1, %v1434_v24 }
 0x552   :  { %v381_v30 = vadd.s32 %v377_v26, %v373_v13  ;;  %v382_v31 = vadd.s32 %v378_v27, %v374_v14  ;;  %v383_v32 = vadd.s32 %v379_v28, %v375_v15  ;;  %v384_v33 = vadd.s32 %v380_v29, %v376_v25 }
 0x554   :  { %v385_v34 = vadd.s32 %v382_v31, %v381_v30  ;;  %v386_v35 = vadd.s32 %v384_v33, %v383_v32 }
 0x556   :  { %v387_v36 = vadd.s32 %v386_v35, %v385_v34 }
 0x558   :  { %v389_v37 = vshrl.u32 %v387_v36, 16  ;;  %v388_v38 = vand.u32 65535, %v387_v36 }
 0x55a   :  { %v391_v39 = vcvt.s32.f32 %v389_v37  ;;  %v390_v40 = vcvt.s32.f32 %v388_v38 }
 0x55c   :  { %394 = vadd.xlane.f32.xlu0 %v391_v39  ;;  %392 = vadd.xlane.f32.xlu1 %v390_v40 }
 0x5e9   :  { %v395_v41 = vpop.xlane.xlu0 %394  ;;  %v393_v42 = vpop.xlane.xlu1 %392 }
 0x5ea   :  { %v397_v43 = vcvt.f32.s32 %v395_v41  ;;  %v396_v45 = vcvt.f32.s32 %v393_v42 }
 0x5ec   :  { %v398_v44 = vshll.u32 %v397_v43, 16 }
 0x5ee   :  { %v399_v46 = vadd.s32 %v398_v44, %v396_v45 }
 0x5f0   :  { %vm400_vm8 = vcmp.ge.s32.totalorder %v399_v46, 256 }
 0x5f1   :  { %v401_v47 = vsel %vm400_vm8, %v364_v12, %v363_v11 }
 0x5f2   :  { %v402_v48 = vor.u32 4194304, %v401_v47 }
 0x5f4   :  { %vm403_vm9 = vcmp.ge.s32.totalorder %v1460_v16, %v402_v48  ;;  %vm404_vm10 = vcmp.ge.s32.totalorder %v1463_v17, %v402_v48  ;;  %vm405_vm11 = vcmp.ge.s32.totalorder %v1466_v18, %v402_v48  ;;  %vm406_vm12 = vcmp.ge.s32.totalorder %v1469_v19, %v402_v48 }
 0x5f5   :  { %vm407_vm13 = vcmp.ge.s32.totalorder %v1472_v20, %v402_v48  ;;  %vm408_vm14 = vcmp.ge.s32.totalorder %v1475_v21, %v402_v48  ;;  %vm409_vm15 = vcmp.ge.s32.totalorder %v1478_v22, %v402_v48  ;;  %vm410_vm0 = vcmp.ge.s32.totalorder %v1481_v23, %v402_v48 }
 0x5f6   :  { %v411_v49 = vsel %vm403_vm9, 1, %v1434_v24  ;;  %v412_v50 = vsel %vm404_vm10, 1, %v1434_v24  ;;  %v413_v51 = vsel %vm405_vm11, 1, %v1434_v24  ;;  %v414_v52 = vsel %vm406_vm12, 1, %v1434_v24 }
 0x5f7   :  { %v415_v53 = vsel %vm407_vm13, 1, %v1434_v24  ;;  %v416_v54 = vsel %vm408_vm14, 1, %v1434_v24  ;;  %v417_v55 = vsel %vm409_vm15, 1, %v1434_v24  ;;  %v418_v56 = vsel %vm410_vm0, 1, %v1434_v24 }
 0x5f8   :  { %v419_v57 = vadd.s32 %v415_v53, %v411_v49  ;;  %v420_v58 = vadd.s32 %v416_v54, %v412_v50  ;;  %v421_v59 = vadd.s32 %v417_v55, %v413_v51  ;;  %v422_v60 = vadd.s32 %v418_v56, %v414_v52 }
 0x5fa   :  { %v423_v61 = vadd.s32 %v420_v58, %v419_v57  ;;  %v424_v62 = vadd.s32 %v422_v60, %v421_v59 }
 0x5fc   :  { %v425_v63 = vadd.s32 %v424_v62, %v423_v61 }
 0x5fe   :  { %v427_v0 = vshrl.u32 %v425_v63, 16  ;;  %v426_v1 = vand.u32 65535, %v425_v63 }
 0x600   :  { %v429_v2 = vcvt.s32.f32 %v427_v0  ;;  %v428_v3 = vcvt.s32.f32 %v426_v1 }
 0x602   :  { %432 = vadd.xlane.f32.xlu0 %v429_v2  ;;  %430 = vadd.xlane.f32.xlu1 %v428_v3 }
 0x68f   :  { %v433_v4 = vpop.xlane.xlu0 %432  ;;  %v431_v5 = vpop.xlane.xlu1 %430 }
 0x690   :  { %v435_v6 = vcvt.f32.s32 %v433_v4  ;;  %v434_v8 = vcvt.f32.s32 %v431_v5 }
 0x692   :  { %v436_v7 = vshll.u32 %v435_v6, 16 }
 0x694   :  { %v437_v9 = vadd.s32 %v436_v7, %v434_v8 }
 0x696   :  { %vm438_vm1 = vcmp.ge.s32.totalorder %v437_v9, 256 }
 0x697   :  { %v439_v10 = vsel %vm438_vm1, %v402_v48, %v401_v47 }
 0x698   :  { %v440_v11 = vor.u32 2097152, %v439_v10 }
 0x69a   :  { %vm441_vm2 = vcmp.ge.s32.totalorder %v1460_v16, %v440_v11  ;;  %vm442_vm3 = vcmp.ge.s32.totalorder %v1463_v17, %v440_v11  ;;  %vm443_vm4 = vcmp.ge.s32.totalorder %v1466_v18, %v440_v11  ;;  %vm444_vm5 = vcmp.ge.s32.totalorder %v1469_v19, %v440_v11 }
 0x69b   :  { %vm445_vm6 = vcmp.ge.s32.totalorder %v1472_v20, %v440_v11  ;;  %vm446_vm7 = vcmp.ge.s32.totalorder %v1475_v21, %v440_v11  ;;  %vm447_vm8 = vcmp.ge.s32.totalorder %v1478_v22, %v440_v11  ;;  %vm448_vm9 = vcmp.ge.s32.totalorder %v1481_v23, %v440_v11 }
 0x69c   :  { %v449_v12 = vsel %vm441_vm2, 1, %v1434_v24  ;;  %v450_v13 = vsel %vm442_vm3, 1, %v1434_v24  ;;  %v451_v14 = vsel %vm443_vm4, 1, %v1434_v24  ;;  %v452_v15 = vsel %vm444_vm5, 1, %v1434_v24 }
 0x69d   :  { %v453_v25 = vsel %vm445_vm6, 1, %v1434_v24  ;;  %v454_v26 = vsel %vm446_vm7, 1, %v1434_v24  ;;  %v455_v27 = vsel %vm447_vm8, 1, %v1434_v24  ;;  %v456_v28 = vsel %vm448_vm9, 1, %v1434_v24 }
 0x69e   :  { %v457_v29 = vadd.s32 %v453_v25, %v449_v12  ;;  %v458_v30 = vadd.s32 %v454_v26, %v450_v13  ;;  %v459_v31 = vadd.s32 %v455_v27, %v451_v14  ;;  %v460_v32 = vadd.s32 %v456_v28, %v452_v15 }
 0x6a0   :  { %v461_v33 = vadd.s32 %v458_v30, %v457_v29  ;;  %v462_v34 = vadd.s32 %v460_v32, %v459_v31 }
 0x6a2   :  { %v463_v35 = vadd.s32 %v462_v34, %v461_v33 }
 0x6a4   :  { %v465_v36 = vshrl.u32 %v463_v35, 16  ;;  %v464_v37 = vand.u32 65535, %v463_v35 }
 0x6a6   :  { %v467_v38 = vcvt.s32.f32 %v465_v36  ;;  %v466_v39 = vcvt.s32.f32 %v464_v37 }
 0x6a8   :  { %470 = vadd.xlane.f32.xlu0 %v467_v38  ;;  %468 = vadd.xlane.f32.xlu1 %v466_v39 }
 0x735   :  { %v471_v40 = vpop.xlane.xlu0 %470  ;;  %v469_v41 = vpop.xlane.xlu1 %468 }
 0x736   :  { %v473_v42 = vcvt.f32.s32 %v471_v40  ;;  %v472_v44 = vcvt.f32.s32 %v469_v41 }
 0x738   :  { %v474_v43 = vshll.u32 %v473_v42, 16 }
 0x73a   :  { %v475_v45 = vadd.s32 %v474_v43, %v472_v44 }
 0x73c   :  { %vm476_vm10 = vcmp.ge.s32.totalorder %v475_v45, 256 }
 0x73d   :  { %v477_v46 = vsel %vm476_vm10, %v440_v11, %v439_v10 }
 0x73e   :  { %v478_v47 = vor.u32 1048576, %v477_v46 }
 0x740   :  { %vm479_vm11 = vcmp.ge.s32.totalorder %v1460_v16, %v478_v47  ;;  %vm480_vm12 = vcmp.ge.s32.totalorder %v1463_v17, %v478_v47  ;;  %vm481_vm13 = vcmp.ge.s32.totalorder %v1466_v18, %v478_v47  ;;  %vm482_vm14 = vcmp.ge.s32.totalorder %v1469_v19, %v478_v47 }
 0x741   :  { %vm483_vm15 = vcmp.ge.s32.totalorder %v1472_v20, %v478_v47  ;;  %vm484_vm0 = vcmp.ge.s32.totalorder %v1475_v21, %v478_v47  ;;  %vm485_vm1 = vcmp.ge.s32.totalorder %v1478_v22, %v478_v47  ;;  %vm486_vm2 = vcmp.ge.s32.totalorder %v1481_v23, %v478_v47 }
 0x742   :  { %v487_v48 = vsel %vm479_vm11, 1, %v1434_v24  ;;  %v488_v49 = vsel %vm480_vm12, 1, %v1434_v24  ;;  %v489_v50 = vsel %vm481_vm13, 1, %v1434_v24  ;;  %v490_v51 = vsel %vm482_vm14, 1, %v1434_v24 }
 0x743   :  { %v491_v52 = vsel %vm483_vm15, 1, %v1434_v24  ;;  %v492_v53 = vsel %vm484_vm0, 1, %v1434_v24  ;;  %v493_v54 = vsel %vm485_vm1, 1, %v1434_v24  ;;  %v494_v55 = vsel %vm486_vm2, 1, %v1434_v24 }
 0x744   :  { %v495_v56 = vadd.s32 %v491_v52, %v487_v48  ;;  %v496_v57 = vadd.s32 %v492_v53, %v488_v49  ;;  %v497_v58 = vadd.s32 %v493_v54, %v489_v50  ;;  %v498_v59 = vadd.s32 %v494_v55, %v490_v51 }
 0x746   :  { %v499_v60 = vadd.s32 %v496_v57, %v495_v56  ;;  %v500_v61 = vadd.s32 %v498_v59, %v497_v58 }
 0x748   :  { %v501_v62 = vadd.s32 %v500_v61, %v499_v60 }
 0x74a   :  { %v503_v63 = vshrl.u32 %v501_v62, 16  ;;  %v502_v0 = vand.u32 65535, %v501_v62 }
 0x74c   :  { %v505_v1 = vcvt.s32.f32 %v503_v63  ;;  %v504_v2 = vcvt.s32.f32 %v502_v0 }
 0x74e   :  { %508 = vadd.xlane.f32.xlu0 %v505_v1  ;;  %506 = vadd.xlane.f32.xlu1 %v504_v2 }
 0x7db   :  { %v509_v3 = vpop.xlane.xlu0 %508  ;;  %v507_v4 = vpop.xlane.xlu1 %506 }
 0x7dc   :  { %v511_v5 = vcvt.f32.s32 %v509_v3  ;;  %v510_v7 = vcvt.f32.s32 %v507_v4 }
 0x7de   :  { %v512_v6 = vshll.u32 %v511_v5, 16 }
 0x7e0   :  { %v513_v8 = vadd.s32 %v512_v6, %v510_v7 }
 0x7e2   :  { %vm514_vm3 = vcmp.ge.s32.totalorder %v513_v8, 256 }
 0x7e3   :  { %v515_v9 = vsel %vm514_vm3, %v478_v47, %v477_v46 }
 0x7e4   :  { %v516_v10 = vor.u32 524288, %v515_v9 }
 0x7e6   :  { %vm517_vm4 = vcmp.ge.s32.totalorder %v1460_v16, %v516_v10  ;;  %vm518_vm5 = vcmp.ge.s32.totalorder %v1463_v17, %v516_v10  ;;  %vm519_vm6 = vcmp.ge.s32.totalorder %v1466_v18, %v516_v10  ;;  %vm520_vm7 = vcmp.ge.s32.totalorder %v1469_v19, %v516_v10 }
 0x7e7   :  { %vm521_vm8 = vcmp.ge.s32.totalorder %v1472_v20, %v516_v10  ;;  %vm522_vm9 = vcmp.ge.s32.totalorder %v1475_v21, %v516_v10  ;;  %vm523_vm10 = vcmp.ge.s32.totalorder %v1478_v22, %v516_v10  ;;  %vm524_vm11 = vcmp.ge.s32.totalorder %v1481_v23, %v516_v10 }
 0x7e8   :  { %v525_v11 = vsel %vm517_vm4, 1, %v1434_v24  ;;  %v526_v12 = vsel %vm518_vm5, 1, %v1434_v24  ;;  %v527_v13 = vsel %vm519_vm6, 1, %v1434_v24  ;;  %v528_v14 = vsel %vm520_vm7, 1, %v1434_v24 }
 0x7e9   :  { %v529_v15 = vsel %vm521_vm8, 1, %v1434_v24  ;;  %v530_v25 = vsel %vm522_vm9, 1, %v1434_v24  ;;  %v531_v26 = vsel %vm523_vm10, 1, %v1434_v24  ;;  %v532_v27 = vsel %vm524_vm11, 1, %v1434_v24 }
 0x7ea   :  { %v533_v28 = vadd.s32 %v529_v15, %v525_v11  ;;  %v534_v29 = vadd.s32 %v530_v25, %v526_v12  ;;  %v535_v30 = vadd.s32 %v531_v26, %v527_v13  ;;  %v536_v31 = vadd.s32 %v532_v27, %v528_v14 }
 0x7ec   :  { %v537_v32 = vadd.s32 %v534_v29, %v533_v28  ;;  %v538_v33 = vadd.s32 %v536_v31, %v535_v30 }
 0x7ee   :  { %v539_v34 = vadd.s32 %v538_v33, %v537_v32 }
 0x7f0   :  { %v541_v35 = vshrl.u32 %v539_v34, 16  ;;  %v540_v36 = vand.u32 65535, %v539_v34 }
 0x7f2   :  { %v543_v37 = vcvt.s32.f32 %v541_v35  ;;  %v542_v38 = vcvt.s32.f32 %v540_v36 }
 0x7f4   :  { %546 = vadd.xlane.f32.xlu0 %v543_v37  ;;  %544 = vadd.xlane.f32.xlu1 %v542_v38 }
 0x881   :  { %v547_v39 = vpop.xlane.xlu0 %546  ;;  %v545_v40 = vpop.xlane.xlu1 %544 }
 0x882   :  { %v549_v41 = vcvt.f32.s32 %v547_v39  ;;  %v548_v43 = vcvt.f32.s32 %v545_v40 }
 0x884   :  { %v550_v42 = vshll.u32 %v549_v41, 16 }
 0x886   :  { %v551_v44 = vadd.s32 %v550_v42, %v548_v43 }
 0x888   :  { %vm552_vm12 = vcmp.ge.s32.totalorder %v551_v44, 256 }
 0x889   :  { %v553_v45 = vsel %vm552_vm12, %v516_v10, %v515_v9 }
 0x88a   :  { %v554_v46 = vor.u32 262144, %v553_v45 }
 0x88c   :  { %vm555_vm13 = vcmp.ge.s32.totalorder %v1460_v16, %v554_v46  ;;  %vm556_vm14 = vcmp.ge.s32.totalorder %v1463_v17, %v554_v46  ;;  %vm557_vm15 = vcmp.ge.s32.totalorder %v1466_v18, %v554_v46  ;;  %vm558_vm0 = vcmp.ge.s32.totalorder %v1469_v19, %v554_v46 }
 0x88d   :  { %vm559_vm1 = vcmp.ge.s32.totalorder %v1472_v20, %v554_v46  ;;  %vm560_vm2 = vcmp.ge.s32.totalorder %v1475_v21, %v554_v46  ;;  %vm561_vm3 = vcmp.ge.s32.totalorder %v1478_v22, %v554_v46  ;;  %vm562_vm4 = vcmp.ge.s32.totalorder %v1481_v23, %v554_v46 }
 0x88e   :  { %v563_v47 = vsel %vm555_vm13, 1, %v1434_v24  ;;  %v564_v48 = vsel %vm556_vm14, 1, %v1434_v24  ;;  %v565_v49 = vsel %vm557_vm15, 1, %v1434_v24  ;;  %v566_v50 = vsel %vm558_vm0, 1, %v1434_v24 }
 0x88f   :  { %v567_v51 = vsel %vm559_vm1, 1, %v1434_v24  ;;  %v568_v52 = vsel %vm560_vm2, 1, %v1434_v24  ;;  %v569_v53 = vsel %vm561_vm3, 1, %v1434_v24  ;;  %v570_v54 = vsel %vm562_vm4, 1, %v1434_v24 }
 0x890   :  { %v571_v55 = vadd.s32 %v567_v51, %v563_v47  ;;  %v572_v56 = vadd.s32 %v568_v52, %v564_v48  ;;  %v573_v57 = vadd.s32 %v569_v53, %v565_v49  ;;  %v574_v58 = vadd.s32 %v570_v54, %v566_v50 }
 0x892   :  { %v575_v59 = vadd.s32 %v572_v56, %v571_v55  ;;  %v576_v60 = vadd.s32 %v574_v58, %v573_v57 }
 0x894   :  { %v577_v61 = vadd.s32 %v576_v60, %v575_v59 }
 0x896   :  { %v579_v62 = vshrl.u32 %v577_v61, 16  ;;  %v578_v63 = vand.u32 65535, %v577_v61 }
 0x898   :  { %v581_v0 = vcvt.s32.f32 %v579_v62  ;;  %v580_v1 = vcvt.s32.f32 %v578_v63 }
 0x89a   :  { %584 = vadd.xlane.f32.xlu0 %v581_v0  ;;  %582 = vadd.xlane.f32.xlu1 %v580_v1 }
 0x927   :  { %v585_v2 = vpop.xlane.xlu0 %584  ;;  %v583_v3 = vpop.xlane.xlu1 %582 }
 0x928   :  { %v587_v4 = vcvt.f32.s32 %v585_v2  ;;  %v586_v6 = vcvt.f32.s32 %v583_v3 }
 0x92a   :  { %v588_v5 = vshll.u32 %v587_v4, 16 }
 0x92c   :  { %v589_v7 = vadd.s32 %v588_v5, %v586_v6 }
 0x92e   :  { %vm590_vm5 = vcmp.ge.s32.totalorder %v589_v7, 256 }
 0x92f   :  { %v591_v8 = vsel %vm590_vm5, %v554_v46, %v553_v45 }
 0x930   :  { %v592_v9 = vor.u32 131072, %v591_v8 }
 0x932   :  { %vm593_vm6 = vcmp.ge.s32.totalorder %v1460_v16, %v592_v9  ;;  %vm594_vm7 = vcmp.ge.s32.totalorder %v1463_v17, %v592_v9  ;;  %vm595_vm8 = vcmp.ge.s32.totalorder %v1466_v18, %v592_v9  ;;  %vm596_vm9 = vcmp.ge.s32.totalorder %v1469_v19, %v592_v9 }
 0x933   :  { %vm597_vm10 = vcmp.ge.s32.totalorder %v1472_v20, %v592_v9  ;;  %vm598_vm11 = vcmp.ge.s32.totalorder %v1475_v21, %v592_v9  ;;  %vm599_vm12 = vcmp.ge.s32.totalorder %v1478_v22, %v592_v9  ;;  %vm600_vm13 = vcmp.ge.s32.totalorder %v1481_v23, %v592_v9 }
 0x934   :  { %v601_v10 = vsel %vm593_vm6, 1, %v1434_v24  ;;  %v602_v11 = vsel %vm594_vm7, 1, %v1434_v24  ;;  %v603_v12 = vsel %vm595_vm8, 1, %v1434_v24  ;;  %v604_v13 = vsel %vm596_vm9, 1, %v1434_v24 }
 0x935   :  { %v605_v14 = vsel %vm597_vm10, 1, %v1434_v24  ;;  %v606_v15 = vsel %vm598_vm11, 1, %v1434_v24  ;;  %v607_v25 = vsel %vm599_vm12, 1, %v1434_v24  ;;  %v608_v26 = vsel %vm600_vm13, 1, %v1434_v24 }
 0x936   :  { %v609_v27 = vadd.s32 %v605_v14, %v601_v10  ;;  %v610_v28 = vadd.s32 %v606_v15, %v602_v11  ;;  %v611_v29 = vadd.s32 %v607_v25, %v603_v12  ;;  %v612_v30 = vadd.s32 %v608_v26, %v604_v13 }
 0x938   :  { %v613_v31 = vadd.s32 %v610_v28, %v609_v27  ;;  %v614_v32 = vadd.s32 %v612_v30, %v611_v29 }
 0x93a   :  { %v615_v33 = vadd.s32 %v614_v32, %v613_v31 }
 0x93c   :  { %v617_v34 = vshrl.u32 %v615_v33, 16  ;;  %v616_v35 = vand.u32 65535, %v615_v33 }
 0x93e   :  { %v619_v36 = vcvt.s32.f32 %v617_v34  ;;  %v618_v37 = vcvt.s32.f32 %v616_v35 }
 0x940   :  { %622 = vadd.xlane.f32.xlu0 %v619_v36  ;;  %620 = vadd.xlane.f32.xlu1 %v618_v37 }
 0x9cd   :  { %v623_v38 = vpop.xlane.xlu0 %622  ;;  %v621_v39 = vpop.xlane.xlu1 %620 }
 0x9ce   :  { %v625_v40 = vcvt.f32.s32 %v623_v38  ;;  %v624_v42 = vcvt.f32.s32 %v621_v39 }
 0x9d0   :  { %v626_v41 = vshll.u32 %v625_v40, 16 }
 0x9d2   :  { %v627_v43 = vadd.s32 %v626_v41, %v624_v42 }
 0x9d4   :  { %vm628_vm14 = vcmp.ge.s32.totalorder %v627_v43, 256 }
 0x9d5   :  { %v629_v44 = vsel %vm628_vm14, %v592_v9, %v591_v8 }
 0x9d6   :  { %v630_v45 = vor.u32 65536, %v629_v44 }
 0x9d8   :  { %vm631_vm15 = vcmp.ge.s32.totalorder %v1460_v16, %v630_v45  ;;  %vm632_vm0 = vcmp.ge.s32.totalorder %v1463_v17, %v630_v45  ;;  %vm633_vm1 = vcmp.ge.s32.totalorder %v1466_v18, %v630_v45  ;;  %vm634_vm2 = vcmp.ge.s32.totalorder %v1469_v19, %v630_v45 }
 0x9d9   :  { %vm635_vm3 = vcmp.ge.s32.totalorder %v1472_v20, %v630_v45  ;;  %vm636_vm4 = vcmp.ge.s32.totalorder %v1475_v21, %v630_v45  ;;  %vm637_vm5 = vcmp.ge.s32.totalorder %v1478_v22, %v630_v45  ;;  %vm638_vm6 = vcmp.ge.s32.totalorder %v1481_v23, %v630_v45 }
 0x9da   :  { %v639_v46 = vsel %vm631_vm15, 1, %v1434_v24  ;;  %v640_v47 = vsel %vm632_vm0, 1, %v1434_v24  ;;  %v641_v48 = vsel %vm633_vm1, 1, %v1434_v24  ;;  %v642_v49 = vsel %vm634_vm2, 1, %v1434_v24 }
 0x9db   :  { %v643_v50 = vsel %vm635_vm3, 1, %v1434_v24  ;;  %v644_v51 = vsel %vm636_vm4, 1, %v1434_v24  ;;  %v645_v52 = vsel %vm637_vm5, 1, %v1434_v24  ;;  %v646_v53 = vsel %vm638_vm6, 1, %v1434_v24 }
 0x9dc   :  { %v647_v54 = vadd.s32 %v643_v50, %v639_v46  ;;  %v648_v55 = vadd.s32 %v644_v51, %v640_v47  ;;  %v649_v56 = vadd.s32 %v645_v52, %v641_v48  ;;  %v650_v57 = vadd.s32 %v646_v53, %v642_v49 }
 0x9de   :  { %v651_v58 = vadd.s32 %v648_v55, %v647_v54  ;;  %v652_v59 = vadd.s32 %v650_v57, %v649_v56 }
 0x9e0   :  { %v653_v60 = vadd.s32 %v652_v59, %v651_v58 }
 0x9e2   :  { %v655_v61 = vshrl.u32 %v653_v60, 16  ;;  %v654_v62 = vand.u32 65535, %v653_v60 }
 0x9e4   :  { %v657_v63 = vcvt.s32.f32 %v655_v61  ;;  %v656_v0 = vcvt.s32.f32 %v654_v62 }
 0x9e6   :  { %660 = vadd.xlane.f32.xlu0 %v657_v63  ;;  %658 = vadd.xlane.f32.xlu1 %v656_v0 }
 0xa73   :  { %v661_v1 = vpop.xlane.xlu0 %660  ;;  %v659_v2 = vpop.xlane.xlu1 %658 }
 0xa74   :  { %v663_v3 = vcvt.f32.s32 %v661_v1  ;;  %v662_v5 = vcvt.f32.s32 %v659_v2 }
 0xa76   :  { %v664_v4 = vshll.u32 %v663_v3, 16 }
 0xa78   :  { %v665_v6 = vadd.s32 %v664_v4, %v662_v5 }
 0xa7a   :  { %vm666_vm7 = vcmp.ge.s32.totalorder %v665_v6, 256 }
 0xa7b   :  { %v667_v7 = vsel %vm666_vm7, %v630_v45, %v629_v44 }
 0xa7c   :  { %v668_v8 = vor.u32 32768, %v667_v7 }
 0xa7e   :  { %vm669_vm8 = vcmp.ge.s32.totalorder %v1460_v16, %v668_v8  ;;  %vm670_vm9 = vcmp.ge.s32.totalorder %v1463_v17, %v668_v8  ;;  %vm671_vm10 = vcmp.ge.s32.totalorder %v1466_v18, %v668_v8  ;;  %vm672_vm11 = vcmp.ge.s32.totalorder %v1469_v19, %v668_v8 }
 0xa7f   :  { %vm673_vm12 = vcmp.ge.s32.totalorder %v1472_v20, %v668_v8  ;;  %vm674_vm13 = vcmp.ge.s32.totalorder %v1475_v21, %v668_v8  ;;  %vm675_vm14 = vcmp.ge.s32.totalorder %v1478_v22, %v668_v8  ;;  %vm676_vm15 = vcmp.ge.s32.totalorder %v1481_v23, %v668_v8 }
 0xa80   :  { %v677_v9 = vsel %vm669_vm8, 1, %v1434_v24  ;;  %v678_v10 = vsel %vm670_vm9, 1, %v1434_v24  ;;  %v679_v11 = vsel %vm671_vm10, 1, %v1434_v24  ;;  %v680_v12 = vsel %vm672_vm11, 1, %v1434_v24 }
 0xa81   :  { %v681_v13 = vsel %vm673_vm12, 1, %v1434_v24  ;;  %v682_v14 = vsel %vm674_vm13, 1, %v1434_v24  ;;  %v683_v15 = vsel %vm675_vm14, 1, %v1434_v24  ;;  %v684_v25 = vsel %vm676_vm15, 1, %v1434_v24 }
 0xa82   :  { %v685_v26 = vadd.s32 %v681_v13, %v677_v9  ;;  %v686_v27 = vadd.s32 %v682_v14, %v678_v10  ;;  %v687_v28 = vadd.s32 %v683_v15, %v679_v11  ;;  %v688_v29 = vadd.s32 %v684_v25, %v680_v12 }
 0xa84   :  { %v689_v30 = vadd.s32 %v686_v27, %v685_v26  ;;  %v690_v31 = vadd.s32 %v688_v29, %v687_v28 }
 0xa86   :  { %v691_v32 = vadd.s32 %v690_v31, %v689_v30 }
 0xa88   :  { %v693_v33 = vshrl.u32 %v691_v32, 16  ;;  %v692_v34 = vand.u32 65535, %v691_v32 }
 0xa8a   :  { %v695_v35 = vcvt.s32.f32 %v693_v33  ;;  %v694_v36 = vcvt.s32.f32 %v692_v34 }
 0xa8c   :  { %698 = vadd.xlane.f32.xlu0 %v695_v35  ;;  %696 = vadd.xlane.f32.xlu1 %v694_v36 }
 0xb19   :  { %v699_v37 = vpop.xlane.xlu0 %698  ;;  %v697_v38 = vpop.xlane.xlu1 %696 }
 0xb1a   :  { %v701_v39 = vcvt.f32.s32 %v699_v37  ;;  %v700_v41 = vcvt.f32.s32 %v697_v38 }
 0xb1c   :  { %v702_v40 = vshll.u32 %v701_v39, 16 }
 0xb1e   :  { %v703_v42 = vadd.s32 %v702_v40, %v700_v41 }
 0xb20   :  { %vm704_vm0 = vcmp.ge.s32.totalorder %v703_v42, 256 }
 0xb21   :  { %v705_v43 = vsel %vm704_vm0, %v668_v8, %v667_v7 }
 0xb22   :  { %v706_v44 = vor.u32 16384, %v705_v43 }
 0xb24   :  { %vm707_vm1 = vcmp.ge.s32.totalorder %v1460_v16, %v706_v44  ;;  %vm708_vm2 = vcmp.ge.s32.totalorder %v1463_v17, %v706_v44  ;;  %vm709_vm3 = vcmp.ge.s32.totalorder %v1466_v18, %v706_v44  ;;  %vm710_vm4 = vcmp.ge.s32.totalorder %v1469_v19, %v706_v44 }
 0xb25   :  { %vm711_vm5 = vcmp.ge.s32.totalorder %v1472_v20, %v706_v44  ;;  %vm712_vm6 = vcmp.ge.s32.totalorder %v1475_v21, %v706_v44  ;;  %vm713_vm7 = vcmp.ge.s32.totalorder %v1478_v22, %v706_v44  ;;  %vm714_vm8 = vcmp.ge.s32.totalorder %v1481_v23, %v706_v44 }
 0xb26   :  { %v715_v45 = vsel %vm707_vm1, 1, %v1434_v24  ;;  %v716_v46 = vsel %vm708_vm2, 1, %v1434_v24  ;;  %v717_v47 = vsel %vm709_vm3, 1, %v1434_v24  ;;  %v718_v48 = vsel %vm710_vm4, 1, %v1434_v24 }
 0xb27   :  { %v719_v49 = vsel %vm711_vm5, 1, %v1434_v24  ;;  %v720_v50 = vsel %vm712_vm6, 1, %v1434_v24  ;;  %v721_v51 = vsel %vm713_vm7, 1, %v1434_v24  ;;  %v722_v52 = vsel %vm714_vm8, 1, %v1434_v24 }
 0xb28   :  { %v723_v53 = vadd.s32 %v719_v49, %v715_v45  ;;  %v724_v54 = vadd.s32 %v720_v50, %v716_v46  ;;  %v725_v55 = vadd.s32 %v721_v51, %v717_v47  ;;  %v726_v56 = vadd.s32 %v722_v52, %v718_v48 }
 0xb2a   :  { %v727_v57 = vadd.s32 %v724_v54, %v723_v53  ;;  %v728_v58 = vadd.s32 %v726_v56, %v725_v55 }
 0xb2c   :  { %v729_v59 = vadd.s32 %v728_v58, %v727_v57 }
 0xb2e   :  { %v731_v60 = vshrl.u32 %v729_v59, 16  ;;  %v730_v61 = vand.u32 65535, %v729_v59 }
 0xb30   :  { %v733_v62 = vcvt.s32.f32 %v731_v60  ;;  %v732_v63 = vcvt.s32.f32 %v730_v61 }
 0xb32   :  { %736 = vadd.xlane.f32.xlu0 %v733_v62  ;;  %734 = vadd.xlane.f32.xlu1 %v732_v63 }
 0xbbf   :  { %v737_v0 = vpop.xlane.xlu0 %736  ;;  %v735_v1 = vpop.xlane.xlu1 %734 }
 0xbc0   :  { %v739_v2 = vcvt.f32.s32 %v737_v0  ;;  %v738_v4 = vcvt.f32.s32 %v735_v1 }
 0xbc2   :  { %v740_v3 = vshll.u32 %v739_v2, 16 }
 0xbc4   :  { %v741_v5 = vadd.s32 %v740_v3, %v738_v4 }
 0xbc6   :  { %vm742_vm9 = vcmp.ge.s32.totalorder %v741_v5, 256 }
 0xbc7   :  { %v743_v6 = vsel %vm742_vm9, %v706_v44, %v705_v43 }
 0xbc8   :  { %v744_v7 = vor.u32 8192, %v743_v6 }
 0xbca   :  { %vm745_vm10 = vcmp.ge.s32.totalorder %v1460_v16, %v744_v7  ;;  %vm746_vm11 = vcmp.ge.s32.totalorder %v1463_v17, %v744_v7  ;;  %vm747_vm12 = vcmp.ge.s32.totalorder %v1466_v18, %v744_v7  ;;  %vm748_vm13 = vcmp.ge.s32.totalorder %v1469_v19, %v744_v7 }
 0xbcb   :  { %vm749_vm14 = vcmp.ge.s32.totalorder %v1472_v20, %v744_v7  ;;  %vm750_vm15 = vcmp.ge.s32.totalorder %v1475_v21, %v744_v7  ;;  %vm751_vm0 = vcmp.ge.s32.totalorder %v1478_v22, %v744_v7  ;;  %vm752_vm1 = vcmp.ge.s32.totalorder %v1481_v23, %v744_v7 }
 0xbcc   :  { %v753_v8 = vsel %vm745_vm10, 1, %v1434_v24  ;;  %v754_v9 = vsel %vm746_vm11, 1, %v1434_v24  ;;  %v755_v10 = vsel %vm747_vm12, 1, %v1434_v24  ;;  %v756_v11 = vsel %vm748_vm13, 1, %v1434_v24 }
 0xbcd   :  { %v757_v12 = vsel %vm749_vm14, 1, %v1434_v24  ;;  %v758_v13 = vsel %vm750_vm15, 1, %v1434_v24  ;;  %v759_v14 = vsel %vm751_vm0, 1, %v1434_v24  ;;  %v760_v15 = vsel %vm752_vm1, 1, %v1434_v24 }
 0xbce   :  { %v761_v25 = vadd.s32 %v757_v12, %v753_v8  ;;  %v762_v26 = vadd.s32 %v758_v13, %v754_v9  ;;  %v763_v27 = vadd.s32 %v759_v14, %v755_v10  ;;  %v764_v28 = vadd.s32 %v760_v15, %v756_v11 }
 0xbd0   :  { %v765_v29 = vadd.s32 %v762_v26, %v761_v25  ;;  %v766_v30 = vadd.s32 %v764_v28, %v763_v27 }
 0xbd2   :  { %v767_v31 = vadd.s32 %v766_v30, %v765_v29 }
 0xbd4   :  { %v769_v32 = vshrl.u32 %v767_v31, 16  ;;  %v768_v33 = vand.u32 65535, %v767_v31 }
 0xbd6   :  { %v771_v34 = vcvt.s32.f32 %v769_v32  ;;  %v770_v35 = vcvt.s32.f32 %v768_v33 }
 0xbd8   :  { %774 = vadd.xlane.f32.xlu0 %v771_v34  ;;  %772 = vadd.xlane.f32.xlu1 %v770_v35 }
 0xc65   :  { %v775_v36 = vpop.xlane.xlu0 %774  ;;  %v773_v37 = vpop.xlane.xlu1 %772 }
 0xc66   :  { %v777_v38 = vcvt.f32.s32 %v775_v36  ;;  %v776_v40 = vcvt.f32.s32 %v773_v37 }
 0xc68   :  { %v778_v39 = vshll.u32 %v777_v38, 16 }
 0xc6a   :  { %v779_v41 = vadd.s32 %v778_v39, %v776_v40 }
 0xc6c   :  { %vm780_vm2 = vcmp.ge.s32.totalorder %v779_v41, 256 }
 0xc6d   :  { %v781_v42 = vsel %vm780_vm2, %v744_v7, %v743_v6 }
 0xc6e   :  { %v782_v43 = vor.u32 4096, %v781_v42 }
 0xc70   :  { %vm783_vm3 = vcmp.ge.s32.totalorder %v1460_v16, %v782_v43  ;;  %vm784_vm4 = vcmp.ge.s32.totalorder %v1463_v17, %v782_v43  ;;  %vm785_vm5 = vcmp.ge.s32.totalorder %v1466_v18, %v782_v43  ;;  %vm786_vm6 = vcmp.ge.s32.totalorder %v1469_v19, %v782_v43 }
 0xc71   :  { %vm787_vm7 = vcmp.ge.s32.totalorder %v1472_v20, %v782_v43  ;;  %vm788_vm8 = vcmp.ge.s32.totalorder %v1475_v21, %v782_v43  ;;  %vm789_vm9 = vcmp.ge.s32.totalorder %v1478_v22, %v782_v43  ;;  %vm790_vm10 = vcmp.ge.s32.totalorder %v1481_v23, %v782_v43 }
 0xc72   :  { %v791_v44 = vsel %vm783_vm3, 1, %v1434_v24  ;;  %v792_v45 = vsel %vm784_vm4, 1, %v1434_v24  ;;  %v793_v46 = vsel %vm785_vm5, 1, %v1434_v24  ;;  %v794_v47 = vsel %vm786_vm6, 1, %v1434_v24 }
 0xc73   :  { %v795_v48 = vsel %vm787_vm7, 1, %v1434_v24  ;;  %v796_v49 = vsel %vm788_vm8, 1, %v1434_v24  ;;  %v797_v50 = vsel %vm789_vm9, 1, %v1434_v24  ;;  %v798_v51 = vsel %vm790_vm10, 1, %v1434_v24 }
 0xc74   :  { %v799_v52 = vadd.s32 %v795_v48, %v791_v44  ;;  %v800_v53 = vadd.s32 %v796_v49, %v792_v45  ;;  %v801_v54 = vadd.s32 %v797_v50, %v793_v46  ;;  %v802_v55 = vadd.s32 %v798_v51, %v794_v47 }
 0xc76   :  { %v803_v56 = vadd.s32 %v800_v53, %v799_v52  ;;  %v804_v57 = vadd.s32 %v802_v55, %v801_v54 }
 0xc78   :  { %v805_v58 = vadd.s32 %v804_v57, %v803_v56 }
 0xc7a   :  { %v807_v59 = vshrl.u32 %v805_v58, 16  ;;  %v806_v60 = vand.u32 65535, %v805_v58 }
 0xc7c   :  { %v809_v61 = vcvt.s32.f32 %v807_v59  ;;  %v808_v62 = vcvt.s32.f32 %v806_v60 }
 0xc7e   :  { %812 = vadd.xlane.f32.xlu0 %v809_v61  ;;  %810 = vadd.xlane.f32.xlu1 %v808_v62 }
 0xd0b   :  { %v813_v63 = vpop.xlane.xlu0 %812  ;;  %v811_v0 = vpop.xlane.xlu1 %810 }
 0xd0c   :  { %v815_v1 = vcvt.f32.s32 %v813_v63  ;;  %v814_v3 = vcvt.f32.s32 %v811_v0 }
 0xd0e   :  { %v816_v2 = vshll.u32 %v815_v1, 16 }
 0xd10   :  { %v817_v4 = vadd.s32 %v816_v2, %v814_v3 }
 0xd12   :  { %vm818_vm11 = vcmp.ge.s32.totalorder %v817_v4, 256 }
 0xd13   :  { %v819_v5 = vsel %vm818_vm11, %v782_v43, %v781_v42 }
 0xd14   :  { %v820_v6 = vor.u32 2048, %v819_v5 }
 0xd16   :  { %vm821_vm12 = vcmp.ge.s32.totalorder %v1460_v16, %v820_v6  ;;  %vm822_vm13 = vcmp.ge.s32.totalorder %v1463_v17, %v820_v6  ;;  %vm823_vm14 = vcmp.ge.s32.totalorder %v1466_v18, %v820_v6  ;;  %vm824_vm15 = vcmp.ge.s32.totalorder %v1469_v19, %v820_v6 }
 0xd17   :  { %vm825_vm0 = vcmp.ge.s32.totalorder %v1472_v20, %v820_v6  ;;  %vm826_vm1 = vcmp.ge.s32.totalorder %v1475_v21, %v820_v6  ;;  %vm827_vm2 = vcmp.ge.s32.totalorder %v1478_v22, %v820_v6  ;;  %vm828_vm3 = vcmp.ge.s32.totalorder %v1481_v23, %v820_v6 }
 0xd18   :  { %v829_v7 = vsel %vm821_vm12, 1, %v1434_v24  ;;  %v830_v8 = vsel %vm822_vm13, 1, %v1434_v24  ;;  %v831_v9 = vsel %vm823_vm14, 1, %v1434_v24  ;;  %v832_v10 = vsel %vm824_vm15, 1, %v1434_v24 }
 0xd19   :  { %v833_v11 = vsel %vm825_vm0, 1, %v1434_v24  ;;  %v834_v12 = vsel %vm826_vm1, 1, %v1434_v24  ;;  %v835_v13 = vsel %vm827_vm2, 1, %v1434_v24  ;;  %v836_v14 = vsel %vm828_vm3, 1, %v1434_v24 }
 0xd1a   :  { %v837_v15 = vadd.s32 %v833_v11, %v829_v7  ;;  %v838_v25 = vadd.s32 %v834_v12, %v830_v8  ;;  %v839_v26 = vadd.s32 %v835_v13, %v831_v9  ;;  %v840_v27 = vadd.s32 %v836_v14, %v832_v10 }
 0xd1c   :  { %v841_v28 = vadd.s32 %v838_v25, %v837_v15  ;;  %v842_v29 = vadd.s32 %v840_v27, %v839_v26 }
 0xd1e   :  { %v843_v30 = vadd.s32 %v842_v29, %v841_v28 }
 0xd20   :  { %v845_v31 = vshrl.u32 %v843_v30, 16  ;;  %v844_v32 = vand.u32 65535, %v843_v30 }
 0xd22   :  { %v847_v33 = vcvt.s32.f32 %v845_v31  ;;  %v846_v34 = vcvt.s32.f32 %v844_v32 }
 0xd24   :  { %850 = vadd.xlane.f32.xlu0 %v847_v33  ;;  %848 = vadd.xlane.f32.xlu1 %v846_v34 }
 0xdb1   :  { %v851_v35 = vpop.xlane.xlu0 %850  ;;  %v849_v36 = vpop.xlane.xlu1 %848 }
 0xdb2   :  { %v853_v37 = vcvt.f32.s32 %v851_v35  ;;  %v852_v39 = vcvt.f32.s32 %v849_v36 }
 0xdb4   :  { %v854_v38 = vshll.u32 %v853_v37, 16 }
 0xdb6   :  { %v855_v40 = vadd.s32 %v854_v38, %v852_v39 }
 0xdb8   :  { %vm856_vm4 = vcmp.ge.s32.totalorder %v855_v40, 256 }
 0xdb9   :  { %v857_v41 = vsel %vm856_vm4, %v820_v6, %v819_v5 }
 0xdba   :  { %v858_v42 = vor.u32 1024, %v857_v41 }
 0xdbc   :  { %vm859_vm5 = vcmp.ge.s32.totalorder %v1460_v16, %v858_v42  ;;  %vm860_vm6 = vcmp.ge.s32.totalorder %v1463_v17, %v858_v42  ;;  %vm861_vm7 = vcmp.ge.s32.totalorder %v1466_v18, %v858_v42  ;;  %vm862_vm8 = vcmp.ge.s32.totalorder %v1469_v19, %v858_v42 }
 0xdbd   :  { %vm863_vm9 = vcmp.ge.s32.totalorder %v1472_v20, %v858_v42  ;;  %vm864_vm10 = vcmp.ge.s32.totalorder %v1475_v21, %v858_v42  ;;  %vm865_vm11 = vcmp.ge.s32.totalorder %v1478_v22, %v858_v42  ;;  %vm866_vm12 = vcmp.ge.s32.totalorder %v1481_v23, %v858_v42 }
 0xdbe   :  { %v867_v43 = vsel %vm859_vm5, 1, %v1434_v24  ;;  %v868_v44 = vsel %vm860_vm6, 1, %v1434_v24  ;;  %v869_v45 = vsel %vm861_vm7, 1, %v1434_v24  ;;  %v870_v46 = vsel %vm862_vm8, 1, %v1434_v24 }
 0xdbf   :  { %v871_v47 = vsel %vm863_vm9, 1, %v1434_v24  ;;  %v872_v48 = vsel %vm864_vm10, 1, %v1434_v24  ;;  %v873_v49 = vsel %vm865_vm11, 1, %v1434_v24  ;;  %v874_v50 = vsel %vm866_vm12, 1, %v1434_v24 }
 0xdc0   :  { %v875_v51 = vadd.s32 %v871_v47, %v867_v43  ;;  %v876_v52 = vadd.s32 %v872_v48, %v868_v44  ;;  %v877_v53 = vadd.s32 %v873_v49, %v869_v45  ;;  %v878_v54 = vadd.s32 %v874_v50, %v870_v46 }
 0xdc2   :  { %v879_v55 = vadd.s32 %v876_v52, %v875_v51  ;;  %v880_v56 = vadd.s32 %v878_v54, %v877_v53 }
 0xdc4   :  { %v881_v57 = vadd.s32 %v880_v56, %v879_v55 }
 0xdc6   :  { %v883_v58 = vshrl.u32 %v881_v57, 16  ;;  %v882_v59 = vand.u32 65535, %v881_v57 }
 0xdc8   :  { %v885_v60 = vcvt.s32.f32 %v883_v58  ;;  %v884_v61 = vcvt.s32.f32 %v882_v59 }
 0xdca   :  { %888 = vadd.xlane.f32.xlu0 %v885_v60  ;;  %886 = vadd.xlane.f32.xlu1 %v884_v61 }
 0xe57   :  { %v889_v62 = vpop.xlane.xlu0 %888  ;;  %v887_v63 = vpop.xlane.xlu1 %886 }
 0xe58   :  { %v891_v0 = vcvt.f32.s32 %v889_v62  ;;  %v890_v2 = vcvt.f32.s32 %v887_v63 }
 0xe5a   :  { %v892_v1 = vshll.u32 %v891_v0, 16 }
 0xe5c   :  { %v893_v3 = vadd.s32 %v892_v1, %v890_v2 }
 0xe5e   :  { %vm894_vm13 = vcmp.ge.s32.totalorder %v893_v3, 256 }
 0xe5f   :  { %v895_v4 = vsel %vm894_vm13, %v858_v42, %v857_v41 }
 0xe60   :  { %v896_v5 = vor.u32 512, %v895_v4 }
 0xe62   :  { %vm897_vm14 = vcmp.ge.s32.totalorder %v1460_v16, %v896_v5  ;;  %vm898_vm15 = vcmp.ge.s32.totalorder %v1463_v17, %v896_v5  ;;  %vm899_vm0 = vcmp.ge.s32.totalorder %v1466_v18, %v896_v5  ;;  %vm900_vm1 = vcmp.ge.s32.totalorder %v1469_v19, %v896_v5 }
 0xe63   :  { %vm901_vm2 = vcmp.ge.s32.totalorder %v1472_v20, %v896_v5  ;;  %vm902_vm3 = vcmp.ge.s32.totalorder %v1475_v21, %v896_v5  ;;  %vm903_vm4 = vcmp.ge.s32.totalorder %v1478_v22, %v896_v5  ;;  %vm904_vm5 = vcmp.ge.s32.totalorder %v1481_v23, %v896_v5 }
 0xe64   :  { %v905_v6 = vsel %vm897_vm14, 1, %v1434_v24  ;;  %v906_v7 = vsel %vm898_vm15, 1, %v1434_v24  ;;  %v907_v8 = vsel %vm899_vm0, 1, %v1434_v24  ;;  %v908_v9 = vsel %vm900_vm1, 1, %v1434_v24 }
 0xe65   :  { %v909_v10 = vsel %vm901_vm2, 1, %v1434_v24  ;;  %v910_v11 = vsel %vm902_vm3, 1, %v1434_v24  ;;  %v911_v12 = vsel %vm903_vm4, 1, %v1434_v24  ;;  %v912_v13 = vsel %vm904_vm5, 1, %v1434_v24 }
 0xe66   :  { %v913_v14 = vadd.s32 %v909_v10, %v905_v6  ;;  %v914_v15 = vadd.s32 %v910_v11, %v906_v7  ;;  %v915_v25 = vadd.s32 %v911_v12, %v907_v8  ;;  %v916_v26 = vadd.s32 %v912_v13, %v908_v9 }
 0xe68   :  { %v917_v27 = vadd.s32 %v914_v15, %v913_v14  ;;  %v918_v28 = vadd.s32 %v916_v26, %v915_v25 }
 0xe6a   :  { %v919_v29 = vadd.s32 %v918_v28, %v917_v27 }
 0xe6c   :  { %v921_v30 = vshrl.u32 %v919_v29, 16  ;;  %v920_v31 = vand.u32 65535, %v919_v29 }
 0xe6e   :  { %v923_v32 = vcvt.s32.f32 %v921_v30  ;;  %v922_v33 = vcvt.s32.f32 %v920_v31 }
 0xe70   :  { %926 = vadd.xlane.f32.xlu0 %v923_v32  ;;  %924 = vadd.xlane.f32.xlu1 %v922_v33 }
 0xefd   :  { %v927_v34 = vpop.xlane.xlu0 %926  ;;  %v925_v35 = vpop.xlane.xlu1 %924 }
 0xefe   :  { %v929_v36 = vcvt.f32.s32 %v927_v34  ;;  %v928_v38 = vcvt.f32.s32 %v925_v35 }
 0xf00   :  { %v930_v37 = vshll.u32 %v929_v36, 16 }
 0xf02   :  { %v931_v39 = vadd.s32 %v930_v37, %v928_v38 }
 0xf04   :  { %vm932_vm6 = vcmp.ge.s32.totalorder %v931_v39, 256 }
 0xf05   :  { %v933_v40 = vsel %vm932_vm6, %v896_v5, %v895_v4 }
 0xf06   :  { %v934_v41 = vor.u32 256, %v933_v40 }
 0xf08   :  { %vm935_vm7 = vcmp.ge.s32.totalorder %v1460_v16, %v934_v41  ;;  %vm936_vm8 = vcmp.ge.s32.totalorder %v1463_v17, %v934_v41  ;;  %vm937_vm9 = vcmp.ge.s32.totalorder %v1466_v18, %v934_v41  ;;  %vm938_vm10 = vcmp.ge.s32.totalorder %v1469_v19, %v934_v41 }
 0xf09   :  { %vm939_vm11 = vcmp.ge.s32.totalorder %v1472_v20, %v934_v41  ;;  %vm940_vm12 = vcmp.ge.s32.totalorder %v1475_v21, %v934_v41  ;;  %vm941_vm13 = vcmp.ge.s32.totalorder %v1478_v22, %v934_v41  ;;  %vm942_vm14 = vcmp.ge.s32.totalorder %v1481_v23, %v934_v41 }
 0xf0a   :  { %v943_v42 = vsel %vm935_vm7, 1, %v1434_v24  ;;  %v944_v43 = vsel %vm936_vm8, 1, %v1434_v24  ;;  %v945_v44 = vsel %vm937_vm9, 1, %v1434_v24  ;;  %v946_v45 = vsel %vm938_vm10, 1, %v1434_v24 }
 0xf0b   :  { %v947_v46 = vsel %vm939_vm11, 1, %v1434_v24  ;;  %v948_v47 = vsel %vm940_vm12, 1, %v1434_v24  ;;  %v949_v48 = vsel %vm941_vm13, 1, %v1434_v24  ;;  %v950_v49 = vsel %vm942_vm14, 1, %v1434_v24 }
 0xf0c   :  { %v951_v50 = vadd.s32 %v947_v46, %v943_v42  ;;  %v952_v51 = vadd.s32 %v948_v47, %v944_v43  ;;  %v953_v52 = vadd.s32 %v949_v48, %v945_v44  ;;  %v954_v53 = vadd.s32 %v950_v49, %v946_v45 }
 0xf0e   :  { %v955_v54 = vadd.s32 %v952_v51, %v951_v50  ;;  %v956_v55 = vadd.s32 %v954_v53, %v953_v52 }
 0xf10   :  { %v957_v56 = vadd.s32 %v956_v55, %v955_v54 }
 0xf12   :  { %v959_v57 = vshrl.u32 %v957_v56, 16  ;;  %v958_v58 = vand.u32 65535, %v957_v56 }
 0xf14   :  { %v961_v59 = vcvt.s32.f32 %v959_v57  ;;  %v960_v60 = vcvt.s32.f32 %v958_v58 }
 0xf16   :  { %964 = vadd.xlane.f32.xlu0 %v961_v59  ;;  %962 = vadd.xlane.f32.xlu1 %v960_v60 }
 0xfa3   :  { %v965_v61 = vpop.xlane.xlu0 %964  ;;  %v963_v62 = vpop.xlane.xlu1 %962 }
 0xfa4   :  { %v967_v63 = vcvt.f32.s32 %v965_v61  ;;  %v966_v1 = vcvt.f32.s32 %v963_v62 }
 0xfa6   :  { %v968_v0 = vshll.u32 %v967_v63, 16 }
 0xfa8   :  { %v969_v2 = vadd.s32 %v968_v0, %v966_v1 }
 0xfaa   :  { %vm970_vm15 = vcmp.ge.s32.totalorder %v969_v2, 256 }
 0xfab   :  { %v971_v3 = vsel %vm970_vm15, %v934_v41, %v933_v40 }
 0xfac   :  { %v972_v4 = vor.u32 128, %v971_v3 }
 0xfae   :  { %vm973_vm0 = vcmp.ge.s32.totalorder %v1460_v16, %v972_v4  ;;  %vm974_vm1 = vcmp.ge.s32.totalorder %v1463_v17, %v972_v4  ;;  %vm975_vm2 = vcmp.ge.s32.totalorder %v1466_v18, %v972_v4  ;;  %vm976_vm3 = vcmp.ge.s32.totalorder %v1469_v19, %v972_v4 }
 0xfaf   :  { %vm977_vm4 = vcmp.ge.s32.totalorder %v1472_v20, %v972_v4  ;;  %vm978_vm5 = vcmp.ge.s32.totalorder %v1475_v21, %v972_v4  ;;  %vm979_vm6 = vcmp.ge.s32.totalorder %v1478_v22, %v972_v4  ;;  %vm980_vm7 = vcmp.ge.s32.totalorder %v1481_v23, %v972_v4 }
 0xfb0   :  { %v981_v5 = vsel %vm973_vm0, 1, %v1434_v24  ;;  %v982_v6 = vsel %vm974_vm1, 1, %v1434_v24  ;;  %v983_v7 = vsel %vm975_vm2, 1, %v1434_v24  ;;  %v984_v8 = vsel %vm976_vm3, 1, %v1434_v24 }
 0xfb1   :  { %v985_v9 = vsel %vm977_vm4, 1, %v1434_v24  ;;  %v986_v10 = vsel %vm978_vm5, 1, %v1434_v24  ;;  %v987_v11 = vsel %vm979_vm6, 1, %v1434_v24  ;;  %v988_v12 = vsel %vm980_vm7, 1, %v1434_v24 }
 0xfb2   :  { %v989_v13 = vadd.s32 %v985_v9, %v981_v5  ;;  %v990_v14 = vadd.s32 %v986_v10, %v982_v6  ;;  %v991_v15 = vadd.s32 %v987_v11, %v983_v7  ;;  %v992_v25 = vadd.s32 %v988_v12, %v984_v8 }
 0xfb4   :  { %v993_v26 = vadd.s32 %v990_v14, %v989_v13  ;;  %v994_v27 = vadd.s32 %v992_v25, %v991_v15 }
 0xfb6   :  { %v995_v28 = vadd.s32 %v994_v27, %v993_v26 }
 0xfb8   :  { %v997_v29 = vshrl.u32 %v995_v28, 16  ;;  %v996_v30 = vand.u32 65535, %v995_v28 }
 0xfba   :  { %v999_v31 = vcvt.s32.f32 %v997_v29  ;;  %v998_v32 = vcvt.s32.f32 %v996_v30 }
 0xfbc   :  { %1002 = vadd.xlane.f32.xlu0 %v999_v31  ;;  %1000 = vadd.xlane.f32.xlu1 %v998_v32 }
0x1049   :  { %v1003_v33 = vpop.xlane.xlu0 %1002  ;;  %v1001_v34 = vpop.xlane.xlu1 %1000 }
0x104a   :  { %v1005_v35 = vcvt.f32.s32 %v1003_v33  ;;  %v1004_v37 = vcvt.f32.s32 %v1001_v34 }
0x104c   :  { %v1006_v36 = vshll.u32 %v1005_v35, 16 }
0x104e   :  { %v1007_v38 = vadd.s32 %v1006_v36, %v1004_v37 }
0x1050   :  { %vm1008_vm8 = vcmp.ge.s32.totalorder %v1007_v38, 256 }
0x1051   :  { %v1009_v39 = vsel %vm1008_vm8, %v972_v4, %v971_v3 }
0x1052   :  { %v1010_v40 = vor.u32 64, %v1009_v39 }
0x1054   :  { %vm1011_vm9 = vcmp.ge.s32.totalorder %v1460_v16, %v1010_v40  ;;  %vm1012_vm10 = vcmp.ge.s32.totalorder %v1463_v17, %v1010_v40  ;;  %vm1013_vm11 = vcmp.ge.s32.totalorder %v1466_v18, %v1010_v40  ;;  %vm1014_vm12 = vcmp.ge.s32.totalorder %v1469_v19, %v1010_v40 }
0x1055   :  { %vm1015_vm13 = vcmp.ge.s32.totalorder %v1472_v20, %v1010_v40  ;;  %vm1016_vm14 = vcmp.ge.s32.totalorder %v1475_v21, %v1010_v40  ;;  %vm1017_vm15 = vcmp.ge.s32.totalorder %v1478_v22, %v1010_v40  ;;  %vm1018_vm0 = vcmp.ge.s32.totalorder %v1481_v23, %v1010_v40 }
0x1056   :  { %v1019_v41 = vsel %vm1011_vm9, 1, %v1434_v24  ;;  %v1020_v42 = vsel %vm1012_vm10, 1, %v1434_v24  ;;  %v1021_v43 = vsel %vm1013_vm11, 1, %v1434_v24  ;;  %v1022_v44 = vsel %vm1014_vm12, 1, %v1434_v24 }
0x1057   :  { %v1023_v45 = vsel %vm1015_vm13, 1, %v1434_v24  ;;  %v1024_v46 = vsel %vm1016_vm14, 1, %v1434_v24  ;;  %v1025_v47 = vsel %vm1017_vm15, 1, %v1434_v24  ;;  %v1026_v48 = vsel %vm1018_vm0, 1, %v1434_v24 }
0x1058   :  { %v1027_v49 = vadd.s32 %v1023_v45, %v1019_v41  ;;  %v1028_v50 = vadd.s32 %v1024_v46, %v1020_v42  ;;  %v1029_v51 = vadd.s32 %v1025_v47, %v1021_v43  ;;  %v1030_v52 = vadd.s32 %v1026_v48, %v1022_v44 }
0x105a   :  { %v1031_v53 = vadd.s32 %v1028_v50, %v1027_v49  ;;  %v1032_v54 = vadd.s32 %v1030_v52, %v1029_v51 }
0x105c   :  { %v1033_v55 = vadd.s32 %v1032_v54, %v1031_v53 }
0x105e   :  { %v1035_v56 = vshrl.u32 %v1033_v55, 16  ;;  %v1034_v57 = vand.u32 65535, %v1033_v55 }
0x1060   :  { %v1037_v58 = vcvt.s32.f32 %v1035_v56  ;;  %v1036_v59 = vcvt.s32.f32 %v1034_v57 }
0x1062   :  { %1040 = vadd.xlane.f32.xlu0 %v1037_v58  ;;  %1038 = vadd.xlane.f32.xlu1 %v1036_v59 }
0x10ef   :  { %v1041_v60 = vpop.xlane.xlu0 %1040  ;;  %v1039_v61 = vpop.xlane.xlu1 %1038 }
0x10f0   :  { %v1043_v62 = vcvt.f32.s32 %v1041_v60  ;;  %v1042_v0 = vcvt.f32.s32 %v1039_v61 }
0x10f2   :  { %v1044_v63 = vshll.u32 %v1043_v62, 16 }
0x10f4   :  { %v1045_v1 = vadd.s32 %v1044_v63, %v1042_v0 }
0x10f6   :  { %vm1046_vm1 = vcmp.ge.s32.totalorder %v1045_v1, 256 }
0x10f7   :  { %v1047_v2 = vsel %vm1046_vm1, %v1010_v40, %v1009_v39 }
0x10f8   :  { %v1048_v3 = vor.u32 32, %v1047_v2 }
0x10fa   :  { %vm1049_vm2 = vcmp.ge.s32.totalorder %v1460_v16, %v1048_v3  ;;  %vm1050_vm3 = vcmp.ge.s32.totalorder %v1463_v17, %v1048_v3  ;;  %vm1051_vm4 = vcmp.ge.s32.totalorder %v1466_v18, %v1048_v3  ;;  %vm1052_vm5 = vcmp.ge.s32.totalorder %v1469_v19, %v1048_v3 }
0x10fb   :  { %vm1053_vm6 = vcmp.ge.s32.totalorder %v1472_v20, %v1048_v3  ;;  %vm1054_vm7 = vcmp.ge.s32.totalorder %v1475_v21, %v1048_v3  ;;  %vm1055_vm8 = vcmp.ge.s32.totalorder %v1478_v22, %v1048_v3  ;;  %vm1056_vm9 = vcmp.ge.s32.totalorder %v1481_v23, %v1048_v3 }
0x10fc   :  { %v1057_v4 = vsel %vm1049_vm2, 1, %v1434_v24  ;;  %v1058_v5 = vsel %vm1050_vm3, 1, %v1434_v24  ;;  %v1059_v6 = vsel %vm1051_vm4, 1, %v1434_v24  ;;  %v1060_v7 = vsel %vm1052_vm5, 1, %v1434_v24 }
0x10fd   :  { %v1061_v8 = vsel %vm1053_vm6, 1, %v1434_v24  ;;  %v1062_v9 = vsel %vm1054_vm7, 1, %v1434_v24  ;;  %v1063_v10 = vsel %vm1055_vm8, 1, %v1434_v24  ;;  %v1064_v11 = vsel %vm1056_vm9, 1, %v1434_v24 }
0x10fe   :  { %v1065_v12 = vadd.s32 %v1061_v8, %v1057_v4  ;;  %v1066_v13 = vadd.s32 %v1062_v9, %v1058_v5  ;;  %v1067_v14 = vadd.s32 %v1063_v10, %v1059_v6  ;;  %v1068_v15 = vadd.s32 %v1064_v11, %v1060_v7 }
0x1100   :  { %v1069_v25 = vadd.s32 %v1066_v13, %v1065_v12  ;;  %v1070_v26 = vadd.s32 %v1068_v15, %v1067_v14 }
0x1102   :  { %v1071_v27 = vadd.s32 %v1070_v26, %v1069_v25 }
0x1104   :  { %v1073_v28 = vshrl.u32 %v1071_v27, 16  ;;  %v1072_v29 = vand.u32 65535, %v1071_v27 }
0x1106   :  { %v1075_v30 = vcvt.s32.f32 %v1073_v28  ;;  %v1074_v31 = vcvt.s32.f32 %v1072_v29 }
0x1108   :  { %1078 = vadd.xlane.f32.xlu0 %v1075_v30  ;;  %1076 = vadd.xlane.f32.xlu1 %v1074_v31 }
0x1195   :  { %v1079_v32 = vpop.xlane.xlu0 %1078  ;;  %v1077_v33 = vpop.xlane.xlu1 %1076 }
0x1196   :  { %v1081_v34 = vcvt.f32.s32 %v1079_v32  ;;  %v1080_v36 = vcvt.f32.s32 %v1077_v33 }
0x1198   :  { %v1082_v35 = vshll.u32 %v1081_v34, 16 }
0x119a   :  { %v1083_v37 = vadd.s32 %v1082_v35, %v1080_v36 }
0x119c   :  { %vm1084_vm10 = vcmp.ge.s32.totalorder %v1083_v37, 256 }
0x119d   :  { %v1085_v38 = vsel %vm1084_vm10, %v1048_v3, %v1047_v2 }
0x119e   :  { %v1086_v39 = vor.u32 16, %v1085_v38 }
0x11a0   :  { %vm1087_vm11 = vcmp.ge.s32.totalorder %v1460_v16, %v1086_v39  ;;  %vm1088_vm12 = vcmp.ge.s32.totalorder %v1463_v17, %v1086_v39  ;;  %vm1089_vm13 = vcmp.ge.s32.totalorder %v1466_v18, %v1086_v39  ;;  %vm1090_vm14 = vcmp.ge.s32.totalorder %v1469_v19, %v1086_v39 }
0x11a1   :  { %vm1091_vm15 = vcmp.ge.s32.totalorder %v1472_v20, %v1086_v39  ;;  %vm1092_vm0 = vcmp.ge.s32.totalorder %v1475_v21, %v1086_v39  ;;  %vm1093_vm1 = vcmp.ge.s32.totalorder %v1478_v22, %v1086_v39  ;;  %vm1094_vm2 = vcmp.ge.s32.totalorder %v1481_v23, %v1086_v39 }
0x11a2   :  { %v1095_v40 = vsel %vm1087_vm11, 1, %v1434_v24  ;;  %v1096_v41 = vsel %vm1088_vm12, 1, %v1434_v24  ;;  %v1097_v42 = vsel %vm1089_vm13, 1, %v1434_v24  ;;  %v1098_v43 = vsel %vm1090_vm14, 1, %v1434_v24 }
0x11a3   :  { %v1099_v44 = vsel %vm1091_vm15, 1, %v1434_v24  ;;  %v1100_v45 = vsel %vm1092_vm0, 1, %v1434_v24  ;;  %v1101_v46 = vsel %vm1093_vm1, 1, %v1434_v24  ;;  %v1102_v47 = vsel %vm1094_vm2, 1, %v1434_v24 }
0x11a4   :  { %v1103_v48 = vadd.s32 %v1099_v44, %v1095_v40  ;;  %v1104_v49 = vadd.s32 %v1100_v45, %v1096_v41  ;;  %v1105_v50 = vadd.s32 %v1101_v46, %v1097_v42  ;;  %v1106_v51 = vadd.s32 %v1102_v47, %v1098_v43 }
0x11a6   :  { %v1107_v52 = vadd.s32 %v1104_v49, %v1103_v48  ;;  %v1108_v53 = vadd.s32 %v1106_v51, %v1105_v50 }
0x11a8   :  { %v1109_v54 = vadd.s32 %v1108_v53, %v1107_v52 }
0x11aa   :  { %v1111_v55 = vshrl.u32 %v1109_v54, 16  ;;  %v1110_v56 = vand.u32 65535, %v1109_v54 }
0x11ac   :  { %v1113_v57 = vcvt.s32.f32 %v1111_v55  ;;  %v1112_v58 = vcvt.s32.f32 %v1110_v56 }
0x11ae   :  { %1116 = vadd.xlane.f32.xlu0 %v1113_v57  ;;  %1114 = vadd.xlane.f32.xlu1 %v1112_v58 }
0x123b   :  { %v1117_v59 = vpop.xlane.xlu0 %1116  ;;  %v1115_v60 = vpop.xlane.xlu1 %1114 }
0x123c   :  { %v1119_v61 = vcvt.f32.s32 %v1117_v59  ;;  %v1118_v63 = vcvt.f32.s32 %v1115_v60 }
0x123e   :  { %v1120_v62 = vshll.u32 %v1119_v61, 16 }
0x1240   :  { %v1121_v0 = vadd.s32 %v1120_v62, %v1118_v63 }
0x1242   :  { %vm1122_vm3 = vcmp.ge.s32.totalorder %v1121_v0, 256 }
0x1243   :  { %v1123_v1 = vsel %vm1122_vm3, %v1086_v39, %v1085_v38 }
0x1244   :  { %v1124_v2 = vor.u32 8, %v1123_v1 }
0x1246   :  { %vm1125_vm4 = vcmp.ge.s32.totalorder %v1460_v16, %v1124_v2  ;;  %vm1126_vm5 = vcmp.ge.s32.totalorder %v1463_v17, %v1124_v2  ;;  %vm1127_vm6 = vcmp.ge.s32.totalorder %v1466_v18, %v1124_v2  ;;  %vm1128_vm7 = vcmp.ge.s32.totalorder %v1469_v19, %v1124_v2 }
0x1247   :  { %vm1129_vm8 = vcmp.ge.s32.totalorder %v1472_v20, %v1124_v2  ;;  %vm1130_vm9 = vcmp.ge.s32.totalorder %v1475_v21, %v1124_v2  ;;  %vm1131_vm10 = vcmp.ge.s32.totalorder %v1478_v22, %v1124_v2  ;;  %vm1132_vm11 = vcmp.ge.s32.totalorder %v1481_v23, %v1124_v2 }
0x1248   :  { %v1133_v3 = vsel %vm1125_vm4, 1, %v1434_v24  ;;  %v1134_v4 = vsel %vm1126_vm5, 1, %v1434_v24  ;;  %v1135_v5 = vsel %vm1127_vm6, 1, %v1434_v24  ;;  %v1136_v6 = vsel %vm1128_vm7, 1, %v1434_v24 }
0x1249   :  { %v1137_v7 = vsel %vm1129_vm8, 1, %v1434_v24  ;;  %v1138_v8 = vsel %vm1130_vm9, 1, %v1434_v24  ;;  %v1139_v9 = vsel %vm1131_vm10, 1, %v1434_v24  ;;  %v1140_v10 = vsel %vm1132_vm11, 1, %v1434_v24 }
0x124a   :  { %v1141_v11 = vadd.s32 %v1137_v7, %v1133_v3  ;;  %v1142_v12 = vadd.s32 %v1138_v8, %v1134_v4  ;;  %v1143_v13 = vadd.s32 %v1139_v9, %v1135_v5  ;;  %v1144_v14 = vadd.s32 %v1140_v10, %v1136_v6 }
0x124c   :  { %v1145_v15 = vadd.s32 %v1142_v12, %v1141_v11  ;;  %v1146_v25 = vadd.s32 %v1144_v14, %v1143_v13 }
0x124e   :  { %v1147_v26 = vadd.s32 %v1146_v25, %v1145_v15 }
0x1250   :  { %v1149_v27 = vshrl.u32 %v1147_v26, 16  ;;  %v1148_v28 = vand.u32 65535, %v1147_v26 }
0x1252   :  { %v1151_v29 = vcvt.s32.f32 %v1149_v27  ;;  %v1150_v30 = vcvt.s32.f32 %v1148_v28 }
0x1254   :  { %1154 = vadd.xlane.f32.xlu0 %v1151_v29  ;;  %1152 = vadd.xlane.f32.xlu1 %v1150_v30 }
0x12e1   :  { %v1155_v31 = vpop.xlane.xlu0 %1154  ;;  %v1153_v32 = vpop.xlane.xlu1 %1152 }
0x12e2   :  { %v1157_v33 = vcvt.f32.s32 %v1155_v31  ;;  %v1156_v35 = vcvt.f32.s32 %v1153_v32 }
0x12e4   :  { %v1158_v34 = vshll.u32 %v1157_v33, 16 }
0x12e6   :  { %v1159_v36 = vadd.s32 %v1158_v34, %v1156_v35 }
0x12e8   :  { %vm1160_vm12 = vcmp.ge.s32.totalorder %v1159_v36, 256 }
0x12e9   :  { %v1161_v37 = vsel %vm1160_vm12, %v1124_v2, %v1123_v1 }
0x12ea   :  { %v1162_v38 = vor.u32 4, %v1161_v37 }
0x12ec   :  { %vm1163_vm13 = vcmp.ge.s32.totalorder %v1460_v16, %v1162_v38  ;;  %vm1164_vm14 = vcmp.ge.s32.totalorder %v1463_v17, %v1162_v38  ;;  %vm1165_vm15 = vcmp.ge.s32.totalorder %v1466_v18, %v1162_v38  ;;  %vm1166_vm0 = vcmp.ge.s32.totalorder %v1469_v19, %v1162_v38 }
0x12ed   :  { %vm1167_vm1 = vcmp.ge.s32.totalorder %v1472_v20, %v1162_v38  ;;  %vm1168_vm2 = vcmp.ge.s32.totalorder %v1475_v21, %v1162_v38  ;;  %vm1169_vm3 = vcmp.ge.s32.totalorder %v1478_v22, %v1162_v38  ;;  %vm1170_vm4 = vcmp.ge.s32.totalorder %v1481_v23, %v1162_v38 }
0x12ee   :  { %v1171_v39 = vsel %vm1163_vm13, 1, %v1434_v24  ;;  %v1172_v40 = vsel %vm1164_vm14, 1, %v1434_v24  ;;  %v1173_v41 = vsel %vm1165_vm15, 1, %v1434_v24  ;;  %v1174_v42 = vsel %vm1166_vm0, 1, %v1434_v24 }
0x12ef   :  { %v1175_v43 = vsel %vm1167_vm1, 1, %v1434_v24  ;;  %v1176_v44 = vsel %vm1168_vm2, 1, %v1434_v24  ;;  %v1177_v45 = vsel %vm1169_vm3, 1, %v1434_v24  ;;  %v1178_v46 = vsel %vm1170_vm4, 1, %v1434_v24 }
0x12f0   :  { %v1179_v47 = vadd.s32 %v1175_v43, %v1171_v39  ;;  %v1180_v48 = vadd.s32 %v1176_v44, %v1172_v40  ;;  %v1181_v49 = vadd.s32 %v1177_v45, %v1173_v41  ;;  %v1182_v50 = vadd.s32 %v1178_v46, %v1174_v42 }
0x12f2   :  { %v1183_v51 = vadd.s32 %v1180_v48, %v1179_v47  ;;  %v1184_v52 = vadd.s32 %v1182_v50, %v1181_v49 }
0x12f4   :  { %v1185_v53 = vadd.s32 %v1184_v52, %v1183_v51 }
0x12f6   :  { %v1187_v54 = vshrl.u32 %v1185_v53, 16  ;;  %v1186_v55 = vand.u32 65535, %v1185_v53 }
0x12f8   :  { %v1189_v56 = vcvt.s32.f32 %v1187_v54  ;;  %v1188_v57 = vcvt.s32.f32 %v1186_v55 }
0x12fa   :  { %1192 = vadd.xlane.f32.xlu0 %v1189_v56  ;;  %1190 = vadd.xlane.f32.xlu1 %v1188_v57 }
0x1387   :  { %v1193_v58 = vpop.xlane.xlu0 %1192  ;;  %v1191_v59 = vpop.xlane.xlu1 %1190 }
0x1388   :  { %v1195_v60 = vcvt.f32.s32 %v1193_v58  ;;  %v1194_v62 = vcvt.f32.s32 %v1191_v59 }
0x138a   :  { %v1196_v61 = vshll.u32 %v1195_v60, 16 }
0x138c   :  { %v1197_v63 = vadd.s32 %v1196_v61, %v1194_v62 }
0x138e   :  { %vm1198_vm5 = vcmp.ge.s32.totalorder %v1197_v63, 256 }
0x138f   :  { %v1199_v0 = vsel %vm1198_vm5, %v1162_v38, %v1161_v37 }
0x1390   :  { %v1200_v1 = vor.u32 2, %v1199_v0 }
0x1392   :  { %vm1201_vm6 = vcmp.ge.s32.totalorder %v1460_v16, %v1200_v1  ;;  %vm1202_vm7 = vcmp.ge.s32.totalorder %v1463_v17, %v1200_v1  ;;  %vm1203_vm8 = vcmp.ge.s32.totalorder %v1466_v18, %v1200_v1  ;;  %vm1204_vm9 = vcmp.ge.s32.totalorder %v1469_v19, %v1200_v1 }
0x1393   :  { %vm1205_vm10 = vcmp.ge.s32.totalorder %v1472_v20, %v1200_v1  ;;  %vm1206_vm11 = vcmp.ge.s32.totalorder %v1475_v21, %v1200_v1  ;;  %vm1207_vm12 = vcmp.ge.s32.totalorder %v1478_v22, %v1200_v1  ;;  %vm1208_vm13 = vcmp.ge.s32.totalorder %v1481_v23, %v1200_v1 }
0x1394   :  { %v1209_v2 = vsel %vm1201_vm6, 1, %v1434_v24  ;;  %v1210_v3 = vsel %vm1202_vm7, 1, %v1434_v24  ;;  %v1211_v4 = vsel %vm1203_vm8, 1, %v1434_v24  ;;  %v1212_v5 = vsel %vm1204_vm9, 1, %v1434_v24 }
0x1395   :  { %v1213_v6 = vsel %vm1205_vm10, 1, %v1434_v24  ;;  %v1214_v7 = vsel %vm1206_vm11, 1, %v1434_v24  ;;  %v1215_v8 = vsel %vm1207_vm12, 1, %v1434_v24  ;;  %v1216_v9 = vsel %vm1208_vm13, 1, %v1434_v24 }
0x1396   :  { %v1217_v10 = vadd.s32 %v1213_v6, %v1209_v2  ;;  %v1218_v11 = vadd.s32 %v1214_v7, %v1210_v3  ;;  %v1219_v12 = vadd.s32 %v1215_v8, %v1211_v4  ;;  %v1220_v13 = vadd.s32 %v1216_v9, %v1212_v5 }
0x1398   :  { %v1221_v14 = vadd.s32 %v1218_v11, %v1217_v10  ;;  %v1222_v15 = vadd.s32 %v1220_v13, %v1219_v12  ;;  %v1377_v12 = vld [vmem:[#allocation2] sm:$0xff] }
0x139a   :  { %v1223_v25 = vadd.s32 %v1222_v15, %v1221_v14  ;;  %v1378_v14 = vld [vmem:[#allocation2 + $0x8] sm:$0xff] }
0x139c   :  { %v1225_v26 = vshrl.u32 %v1223_v25, 16  ;;  %v1224_v27 = vand.u32 65535, %v1223_v25 }
0x139e   :  { %v1227_v28 = vcvt.s32.f32 %v1225_v26  ;;  %v1226_v29 = vcvt.s32.f32 %v1224_v27 }
0x13a0   :  { %1230 = vadd.xlane.f32.xlu0 %v1227_v28  ;;  %1228 = vadd.xlane.f32.xlu1 %v1226_v29  ;;  %v1379_v28 = vld [vmem:[#allocation2 + $0x10] sm:$0xff] }
0x142d   :  { %v1231_v30 = vpop.xlane.xlu0 %1230  ;;  %v1229_v31 = vpop.xlane.xlu1 %1228 }
0x142e   :  { %v1233_v32 = vcvt.f32.s32 %v1231_v30  ;;  %v1232_v34 = vcvt.f32.s32 %v1229_v31  ;;  %v1380_v30 = vld [vmem:[#allocation2 + $0x18] sm:$0xff] }
0x1430   :  { %v1234_v33 = vshll.u32 %v1233_v32, 16  ;;  %v1381_v32 = vld [vmem:[#allocation2 + $0x20] sm:$0xff] }
0x1432   :  { %v1235_v35 = vadd.s32 %v1234_v33, %v1232_v34 }
0x1434   :  { %vm1236_vm14 = vcmp.ge.s32.totalorder %v1235_v35, 256 }
0x1435   :  { %v1237_v36 = vsel %vm1236_vm14, %v1200_v1, %v1199_v0 }
0x1436   :  { %v1238_v37 = vor.u32 1, %v1237_v36 }
0x1438   :  { %vm1239_vm15 = vcmp.ge.s32.totalorder %v1460_v16, %v1238_v37  ;;  %vm1240_vm0 = vcmp.ge.s32.totalorder %v1463_v17, %v1238_v37  ;;  %vm1241_vm1 = vcmp.ge.s32.totalorder %v1466_v18, %v1238_v37  ;;  %vm1242_vm2 = vcmp.ge.s32.totalorder %v1469_v19, %v1238_v37 }
0x1439   :  { %vm1243_vm3 = vcmp.ge.s32.totalorder %v1472_v20, %v1238_v37  ;;  %vm1244_vm4 = vcmp.ge.s32.totalorder %v1475_v21, %v1238_v37  ;;  %vm1245_vm5 = vcmp.ge.s32.totalorder %v1478_v22, %v1238_v37  ;;  %vm1246_vm6 = vcmp.ge.s32.totalorder %v1481_v23, %v1238_v37 }
0x143a   :  { %v1247_v38 = vsel %vm1239_vm15, 1, %v1434_v24  ;;  %v1248_v39 = vsel %vm1240_vm0, 1, %v1434_v24  ;;  %v1249_v40 = vsel %vm1241_vm1, 1, %v1434_v24  ;;  %v1250_v41 = vsel %vm1242_vm2, 1, %v1434_v24 }
0x143b   :  { %v1251_v42 = vsel %vm1243_vm3, 1, %v1434_v24  ;;  %v1252_v43 = vsel %vm1244_vm4, 1, %v1434_v24  ;;  %v1253_v44 = vsel %vm1245_vm5, 1, %v1434_v24  ;;  %v1254_v45 = vsel %vm1246_vm6, 1, %v1434_v24 }
0x143c   :  { %v1255_v46 = vadd.s32 %v1251_v42, %v1247_v38  ;;  %v1256_v47 = vadd.s32 %v1252_v43, %v1248_v39  ;;  %v1257_v48 = vadd.s32 %v1253_v44, %v1249_v40  ;;  %v1258_v49 = vadd.s32 %v1254_v45, %v1250_v41  ;;  %v1383_v38 = vld [vmem:[#allocation2 + $0x30] sm:$0xff]  ;;  %v1384_v40 = vld [vmem:[#allocation2 + $0x38] sm:$0xff] }
0x143e   :  { %v1259_v50 = vadd.s32 %v1256_v47, %v1255_v46  ;;  %v1260_v51 = vadd.s32 %v1258_v49, %v1257_v48 }
0x1440   :  { %v1261_v52 = vadd.s32 %v1260_v51, %v1259_v50 }
0x1442   :  { %v1263_v53 = vshrl.u32 %v1261_v52, 16  ;;  %v1262_v54 = vand.u32 65535, %v1261_v52 }
0x1444   :  { %v1265_v55 = vcvt.s32.f32 %v1263_v53  ;;  %v1264_v56 = vcvt.s32.f32 %v1262_v54 }
0x1446   :  { %1268 = vadd.xlane.f32.xlu0 %v1265_v55  ;;  %1266 = vadd.xlane.f32.xlu1 %v1264_v56 }
0x14d3   :  { %v1269_v57 = vpop.xlane.xlu0 %1268  ;;  %v1267_v58 = vpop.xlane.xlu1 %1266 }
0x14d4   :  { %v1271_v59 = vcvt.f32.s32 %v1269_v57  ;;  %v1270_v61 = vcvt.f32.s32 %v1267_v58 }
0x14d6   :  { %v1272_v60 = vshll.u32 %v1271_v59, 16 }
0x14d8   :  { %v1273_v62 = vadd.s32 %v1272_v60, %v1270_v61 }
0x14da   :  { %vm1274_vm7 = vcmp.ge.s32.totalorder %v1273_v62, 256 }
0x14db   :  { %v1995_v63 = vsel %vm1274_vm7, %v1238_v37, %v1237_v36  ;;  %v1382_v36 = vld [vmem:[#allocation2 + $0x28] sm:$0xff] }
0x14dc   :  { %vm1276_vm8 = vcmp.gt.s32.totalorder %v1460_v16, %v1995_v63  ;;  %vm1277_vm9 = vcmp.gt.s32.totalorder %v1463_v17, %v1995_v63  ;;  %vm1278_vm10 = vcmp.gt.s32.totalorder %v1466_v18, %v1995_v63  ;;  %vm1279_vm11 = vcmp.gt.s32.totalorder %v1469_v19, %v1995_v63 }
0x14dd   :  { %vm1280_vm12 = vcmp.gt.s32.totalorder %v1472_v20, %v1995_v63  ;;  %vm1281_vm13 = vcmp.gt.s32.totalorder %v1475_v21, %v1995_v63  ;;  %vm1282_vm14 = vcmp.gt.s32.totalorder %v1478_v22, %v1995_v63  ;;  %vm1283_vm15 = vcmp.gt.s32.totalorder %v1481_v23, %v1995_v63 }
0x14de   :  { %v1284_v0 = vsel %vm1276_vm8, 1, %v1434_v24  ;;  %v1285_v1 = vsel %vm1277_vm9, 1, %v1434_v24  ;;  %v1286_v2 = vsel %vm1278_vm10, 1, %v1434_v24  ;;  %v1287_v3 = vsel %vm1279_vm11, 1, %v1434_v24 }
0x14df   :  { %v1288_v4 = vsel %vm1280_vm12, 1, %v1434_v24  ;;  %v1289_v5 = vsel %vm1281_vm13, 1, %v1434_v24  ;;  %v1290_v6 = vsel %vm1282_vm14, 1, %v1434_v24  ;;  %v1291_v7 = vsel %vm1283_vm15, 1, %v1434_v24 }
0x14e0   :  { %v1292_v8 = vadd.s32 %v1288_v4, %v1284_v0  ;;  %v1293_v9 = vadd.s32 %v1289_v5, %v1285_v1  ;;  %v1294_v10 = vadd.s32 %v1290_v6, %v1286_v2  ;;  %v1295_v11 = vadd.s32 %v1291_v7, %v1287_v3 }
0x14e1   :  { %v1311_v13 = vsel %vm1276_vm8, %v1377_v12, 0.0  ;;  %v1312_v15 = vsel %vm1277_vm9, %v1378_v14, 0.0  ;;  %vm1328_vm0 = vcmp.eq.s32.totalorder %v1460_v16, %v1995_v63  ;;  %vm1329_vm1 = vcmp.eq.s32.totalorder %v1463_v17, %v1995_v63 }
0x14e2   :  { %v1296_v25 = vadd.s32 %v1293_v9, %v1292_v8  ;;  %v1297_v26 = vadd.s32 %v1295_v11, %v1294_v10  ;;  %v1319_v24 = vadd.f32 %v1312_v15, %v1311_v13  ;;  %vm1330_vm2 = vcmp.eq.s32.totalorder %v1466_v18, %v1995_v63 }
0x14e3   :  { %vm1331_vm3 = vcmp.eq.s32.totalorder %v1469_v19, %v1995_v63  ;;  %vm1332_vm4 = vcmp.eq.s32.totalorder %v1472_v20, %v1995_v63  ;;  %vm1333_vm5 = vcmp.eq.s32.totalorder %v1475_v21, %v1995_v63  ;;  %vm1334_vm6 = vcmp.eq.s32.totalorder %v1478_v22, %v1995_v63 }
0x14e4   :  { %v1298_v27 = vadd.s32 %v1297_v26, %v1296_v25  ;;  %vm1335_vm7 = vcmp.eq.s32.totalorder %v1481_v23, %v1995_v63  ;;  %v1336_v16 = vsel %vm1328_vm0, %v1377_v12, -inf  ;;  %v1337_v17 = vsel %vm1329_vm1, %v1378_v14, -inf }
0x14e5   :  { %v1338_v29 = vsel %vm1330_vm2, %v1379_v28, -inf  ;;  %v1339_v31 = vsel %vm1331_vm3, %v1380_v30, -inf  ;;  %v1340_v33 = vsel %vm1332_vm4, %v1381_v32, -inf  ;;  %v1341_v37 = vsel %vm1333_vm5, %v1382_v36, -inf }
0x14e6   :  { %v1300_v34 = vshrl.u32 %v1298_v27, 16  ;;  %v1299_v35 = vand.u32 65535, %v1298_v27  ;;  %v1342_v39 = vsel %vm1334_vm6, %v1383_v38, -inf  ;;  %v1343_v41 = vsel %vm1335_vm7, %v1384_v40, -inf }
0x14e7   :  { %v1344_v42 = vmax.f32 %v1336_v16, %v1340_v33  ;;  %v1345_v43 = vmax.f32 %v1337_v17, %v1341_v37  ;;  %v1346_v44 = vmax.f32 %v1338_v29, %v1342_v39  ;;  %v1347_v47 = vmax.f32 %v1339_v31, %v1343_v41 }
0x14e8   :  { %v1302_v45 = vcvt.s32.f32 %v1300_v34  ;;  %v1301_v46 = vcvt.s32.f32 %v1299_v35  ;;  %v1313_v48 = vsel %vm1278_vm10, %v1379_v28, 0.0  ;;  %v1314_v52 = vsel %vm1279_vm11, %v1380_v30, 0.0 }
0x14e9   :  { %v1348_v49 = vmax.f32 %v1344_v42, %v1345_v43  ;;  %v1349_v50 = vmax.f32 %v1346_v44, %v1347_v47  ;;  %v1320_v51 = vadd.f32 %v1319_v24, %v1313_v48  ;;  %v1315_v55 = vsel %vm1280_vm12, %v1381_v32, 0.0 }
0x14ea   :  { %1305 = vadd.xlane.f32.xlu0 %v1302_v45  ;;  %1303 = vadd.xlane.f32.xlu1 %v1301_v46  ;;  %v1316_v18 = vsel %vm1281_vm13, %v1382_v36, 0.0  ;;  %v1317_v58 = vsel %vm1282_vm14, %v1383_v38, 0.0  ;;  %v1318_v19 = vsel %vm1283_vm15, %v1384_v40, 0.0 }
0x14eb   :  { %v1350_v53 = vmax.f32 %v1348_v49, %v1349_v50  ;;  %v1321_v54 = vadd.f32 %v1320_v51, %v1314_v52 }
0x14ed   :  { %v1322_v56 = vadd.f32 %v1321_v54, %v1315_v55 }
0x14ee   :  { %1351 = vmax.xlane.f32.xlu0 %v1350_v53 }
0x14ef   :  { %v1323_v57 = vadd.f32 %v1322_v56, %v1316_v18 }
0x14f1   :  { %v1324_v59 = vadd.f32 %v1323_v57, %v1317_v58 }
0x14f3   :  { %v1325_v60 = vadd.f32 %v1324_v59, %v1318_v19 }
0x14f5   :  { %1326 = vadd.xlane.f32.xlu1 %v1325_v60 }
0x1577   :  { %v1306_v20 = vpop.xlane.xlu0 %1305  ;;  %v1304_v61 = vpop.xlane.xlu1 %1303 }
0x1578   :  { %v1308_v62 = vcvt.f32.s32 %v1306_v20  ;;  %v1307_v1 = vcvt.f32.s32 %v1304_v61 }
0x157a   :  { %v1309_v0 = vshll.u32 %v1308_v62, 16 }
0x157b   :  { %v1352_v4 = vpop.xlane.xlu0 %1351 }
0x157c   :  { %v1310_v2 = vadd.s32 %v1309_v0, %v1307_v1 }
0x157e   :  { %v1353_v21 = vcvt.s32.f32 %v1310_v2 }
0x1580   :  { %v1354_v3 = vsub.f32 256.0, %v1353_v21 }
0x1582   :  { %v1355_v22 = vmul.f32 %v1354_v3, %v1352_v4  ;;  %v1327_v5 = vpop.xlane.xlu1 %1326 }
0x1584   :  { %v1356_v6 = vadd.f32 %v1355_v22, %v1327_v5 }
0x1586   :  { %1357 = vst [vmem:[#allocation5] sm:$0xff] %v1356_v6 }
0x1587   :  { %1418 = shalt.err (!%p1415_p12)
}
0x1588   :  { %s1419_s22 = scalar_lea.hbm %s2101_s1, 128 }
0x1589   :  { %p1420_p13 = scmp.ne.s32.totalorder %s2101_s1, %s1419_s22  ;;  %p1423_p0 = scmp.lt.u32.totalorder %s1419_s22, %s2101_s1 }
0x158b   :  { %p1425_p1 = pnand %p1423_p0, %p1420_p13 }
0x158d   :  { %1428 = shalt.err (!%p1425_p1)
}
0x158e   :  { %1367 = dma.vmem_to_hbm [thread:$0]  %s1365_s18, 128, %s2101_s1, [#allocation4]  }
0x158f   :  { %1431 = dma.done.wait [#allocation4], 128  }
0x1590   :  { %1432 = vsyncadd [#allocation4], 4294967168 }
0x1591   :  { %1371 = vsyncpa [#allocation3], 1 }
0x1592   :  { %1372 = vsyncpa [#allocation4], 1 }

</bundles_post_ra>
